<compile_context>
chip_gen: v5e
topology: v5e:2x2
jax: 0.10.0
libtpu: 0.0.40
codegen_flags: <defaults>
</compile_context>

<pallas_src>
import jax
import jax.numpy as jnp
from jax import lax
from jax.experimental import pallas as pl
from jax.experimental.pallas import tpu as pltpu


def _vmem():
    return pl.BlockSpec(memory_space=pltpu.MemorySpace.VMEM)


# ---------------------------------------------------------------------------
# Fused kernel: all LSTM layers (wavefront-unrolled) + last-step single-head
# attention + residual + final Linear, in one grid-less pallas_call.
# ---------------------------------------------------------------------------
def make_fused_kernel(num_layers, T, B, H, O, mxu_dtype, exact_softmax):
    md = mxu_dtype
    L = num_layers

    def kernel(*refs):
        # ---- unpack refs: inputs then output --------------------------------
        x_ref = refs[0]                                   # (T*B, Din) f32, time-major flat
        layer_refs = refs[1:1 + 3 * L]                    # per layer: w_ih_t(md), w_hh_t(md), b(f32)
        base = 1 + 3 * L
        h0_ref, c0_ref = refs[base], refs[base + 1]       # (L, B, H) f32 each
        (aw_in_ref, ab_in_ref, aw_out_ref, ab_out_ref,
         lw_ref, lb_ref) = refs[base + 2:base + 8]
        out_ref = refs[base + 8]                          # (B, O)

        # ---- hoisted layer-0 input projection (off the recurrence) ----------
        w_ih0 = layer_refs[0][...]                        # (Din, 4H), pre-cast to md
        b0 = layer_refs[2][...]                           # (1, 4H)   f32
        xw0 = jnp.dot(x_ref[...].astype(md), w_ih0,
                      preferred_element_type=jnp.float32) + b0      # (T*B, 4H) f32

        def lstm_cell(gates, c_prev):
            # Gates laid out as [i | f | o | g]: one sigmoid pass covers
            # lanes 0..3H-1, one tanh pass covers 3H..4H-1.
            sig = jax.nn.sigmoid(gates[:, 0:3 * H])
            g_g = jnp.tanh(gates[:, 3 * H:4 * H])
            i_g = sig[:, 0 * H:1 * H]
            f_g = sig[:, 1 * H:2 * H]
            o_g = sig[:, 2 * H:3 * H]
            c_new = f_g * c_prev + i_g * g_g
            h_new = o_g * jnp.tanh(c_new)
            return h_new, c_new

        h = [h0_ref[l] for l in range(L)]                 # (B, H) f32 each
        c = [c0_ref[l] for l in range(L)]

        # ---- wavefront schedule, fully unrolled ------------------------------
        # At wave w, layer l runs time step t = w - l; layer l reads h[l-1]
        # which (pre-wave) holds layer l-1's output at exactly time t.
        # State writes are committed only after all layers of the wave have
        # computed, so intra-wave reads always see pre-wave values.
        for w in range(T + L - 1):
            updates = {}
            for l in range(L):
                t = w - l
                if not (0 <= t < T):
                    continue
                if l == 0:
                    xw = xw0[t * B:(t + 1) * B, :]                        # (B, 4H)
                else:
                    w_ih_l = layer_refs[3 * l][...]                       # (H, 4H) md
                    b_l = layer_refs[3 * l + 2][...]                      # (1, 4H) f32
                    xw = jnp.dot(h[l - 1].astype(md), w_ih_l,
                                 preferred_element_type=jnp.float32) + b_l
                w_hh_l = layer_refs[3 * l + 1][...]                       # (H, 4H) md
                gates = xw + jnp.dot(h[l].astype(md), w_hh_l,
                                     preferred_element_type=jnp.float32)
                updates[l] = lstm_cell(gates, c[l])
            for l, (hn, cn) in updates.items():
                h[l] = hn
                c[l] = cn

        # ---- single-head attention at the last time step only ---------------
        # The (deliberately transposition-buggy) nn.MultiheadAttention call
        # treats T as the attention batch; only attn-batch n = T-1 reaches the
        # module output, attending over ula[:, -1, :] = h[L-1] (B, H).
        u = h[L - 1]                                                     # (B, H) f32
        qkv = jnp.dot(u.astype(md), aw_in_ref[...],
                      preferred_element_type=jnp.float32) + ab_in_ref[...]  # (B, 3H)
        q = qkv[:, 0 * H:1 * H]
        k = qkv[:, 1 * H:2 * H]
        v = qkv[:, 2 * H:3 * H]
        scale = jnp.float32(1.0 / (H ** 0.5))
        # contract last dims of q and k: no explicit transpose / relayout of k.
        scores = lax.dot_general(q, k, (((1,), (1,)), ((), ())),
                                 preferred_element_type=jnp.float32) * scale  # (B, B)
        scores = scores - jnp.max(scores, axis=-1, keepdims=True)
        p = jnp.exp(scores)
        denom = jnp.sum(p, axis=-1, keepdims=True)
        if exact_softmax:
            p = p / denom                                  # exact path (f32 verification)
        else:
            p = p * pl.reciprocal(denom, approx=True)      # EUP slot, fast path
        ctx = jnp.dot(p, v, preferred_element_type=jnp.float32)              # (B, H)
        att = jnp.dot(ctx.astype(md), aw_out_ref[...],
                      preferred_element_type=jnp.float32) + ab_out_ref[...]  # (B, H)
        att = att + u                                      # residual: att_out += ula
        out_ref[...] = (jnp.dot(att.astype(md), lw_ref[...],
                                preferred_element_type=jnp.float32)
                        + lb_ref[...])                     # (B, O)

    return kernel


def attention_lstm_forward(kparams, input_seq):
    """input_seq: (B, T, D_in) float32, batch_first (same as the PyTorch module).

    kparams come from prepare_kernel_params (gate-reordered / transposed /
    pre-cast weights)."""
    B, T, Din = input_seq.shape
    L = len(kparams['lstm'])
    H = kparams['lstm'][0]['w_hh_t'].shape[0]
    O = kparams['lin_w_t'].shape[1]
    md = kparams['lstm'][0]['w_ih_t'].dtype
    exact = (md == jnp.float32)

    # one-off tiny host-side relayout: time-major, flat 2-D (no 3-D reshapes in-kernel)
    x_flat = jnp.transpose(input_seq, (1, 0, 2)).reshape(T * B, Din).astype(jnp.float32)

    args = [x_flat]
    for lp in kparams['lstm']:
        args += [lp['w_ih_t'], lp['w_hh_t'], lp['b']]
    args += [kparams['h0'], kparams['c0'],
             kparams['att_w_in_t'], kparams['att_b_in'],
             kparams['att_w_out_t'], kparams['att_b_out'],
             kparams['lin_w_t'], kparams['lin_b']]

    kernel = make_fused_kernel(L, T, B, H, O, md, exact)
    return pl.pallas_call(
        kernel,
        out_shape=jax.ShapeDtypeStruct((B, O), jnp.float32),
        in_specs=[_vmem()] * len(args),
        out_specs=_vmem(),
    )(*args)


# ---------------------------------------------------------------------------
# Parameter handling.
#   init_params: PyTorch-layout weights ([i,f,g,o] gate rows, (out,in) matrices).
#   prepare_kernel_params: gate reorder to [i,f,o,g], transpose, fold biases,
#   pre-cast matmul weights to the MXU dtype (biases / h0 / c0 stay f32).
# ---------------------------------------------------------------------------
def init_params(key, input_features_num, lstm_hidden, lstm_layers,
                output_len, batch_size):
    H = lstm_hidden
    keys = iter(jax.random.split(key, 8 * lstm_layers + 16))

    def rnd(shape, scale=0.1):
        return (scale * jax.random.normal(next(keys), shape)).astype(jnp.float32)

    lstm_params = []
    for l in range(lstm_layers):
        din = input_features_num if l == 0 else H
        lstm_params.append(dict(
            w_ih=rnd((4 * H, din)),        # PyTorch layout, gate rows [i,f,g,o]
            w_hh=rnd((4 * H, H)),
            b_ih=rnd((4 * H,)),
            b_hh=rnd((4 * H,)),
        ))

    return dict(
        lstm=lstm_params,
        # deterministic stand-ins for torch.randn(h_0), torch.randn(c_0)
        h0=rnd((lstm_layers, batch_size, H), scale=1.0),
        c0=rnd((lstm_layers, batch_size, H), scale=1.0),
        att_w_in=rnd((3 * H, H)),          # MHA in_proj_weight
        att_b_in=rnd((3 * H,)),
        att_w_out=rnd((H, H)),             # MHA out_proj.weight
        att_b_out=rnd((H,)),
        lin_w=rnd((output_len, H)),
        lin_b=rnd((output_len,)),
    )


def prepare_kernel_params(params, mxu_dtype=jnp.bfloat16):
    H = params['lstm'][0]['w_hh'].shape[1]
    O = params['lin_w'].shape[0]
    # gate-row permutation [i,f,g,o] -> [i,f,o,g] (one sigmoid pass + one tanh pass)
    perm = jnp.concatenate([jnp.arange(0, 2 * H),
                            jnp.arange(3 * H, 4 * H),
                            jnp.arange(2 * H, 3 * H)])
    lstm = []
    for lp in params['lstm']:
        w_ih = lp['w_ih'][perm]
        w_hh = lp['w_hh'][perm]
        b = (lp['b_ih'] + lp['b_hh'])[perm]
        lstm.append(dict(
            w_ih_t=w_ih.T.astype(mxu_dtype),                  # (Din, 4H)
            w_hh_t=w_hh.T.astype(mxu_dtype),                  # (H, 4H)
            b=b.reshape(1, 4 * H).astype(jnp.float32),
        ))
    return dict(
        lstm=lstm,
        h0=params['h0'].astype(jnp.float32),
        c0=params['c0'].astype(jnp.float32),
        att_w_in_t=params['att_w_in'].T.astype(mxu_dtype),    # (H, 3H)
        att_b_in=params['att_b_in'].reshape(1, 3 * H).astype(jnp.float32),
        att_w_out_t=params['att_w_out'].T.astype(mxu_dtype),  # (H, H)
        att_b_out=params['att_b_out'].reshape(1, H).astype(jnp.float32),
        lin_w_t=params['lin_w'].T.astype(mxu_dtype),          # (H, O)
        lin_b=params['lin_b'].reshape(1, O).astype(jnp.float32),
    )


# ---------------------------------------------------------------------------
# Pure-JAX reference (full, unpruned PyTorch forward) for correctness checking.
# Uses the original PyTorch-layout parameters.
# ---------------------------------------------------------------------------
def reference_forward(params, input_seq):
    hp = lax.Precision.HIGHEST
    B, T, _ = input_seq.shape
    H = params['lstm'][0]['w_hh'].shape[1]
    x = jnp.transpose(input_seq, (1, 0, 2)).astype(jnp.float32)   # (T, B, Din)
    for l, lp in enumerate(params['lstm']):
        h, c = params['h0'][l], params['c0'][l]
        ys = []
        for t in range(T):
            g = (jnp.dot(x[t], lp['w_ih'].T, precision=hp)
                 + jnp.dot(h, lp['w_hh'].T, precision=hp)
                 + lp['b_ih'] + lp['b_hh'])
            i = jax.nn.sigmoid(g[:, 0 * H:1 * H])
            f = jax.nn.sigmoid(g[:, 1 * H:2 * H])
            gg = jnp.tanh(g[:, 2 * H:3 * H])
            o = jax.nn.sigmoid(g[:, 3 * H:4 * H])
            c = f * c + i * gg
            h = o * jnp.tanh(c)
            ys.append(h)
        x = jnp.stack(ys, axis=0)                                 # (T, B, H)
    ula = x
    # MHA applied to the batch_first tensor: batch axis = T, sequence axis = B.
    qkv = jnp.einsum('tbh,fh->tbf', ula, params['att_w_in'],
                     precision=hp) + params['att_b_in']
    q, k, v = qkv[..., 0:H], qkv[..., H:2 * H], qkv[..., 2 * H:3 * H]
    s = jnp.einsum('tbe,tce->tbc', q, k, precision=hp) / jnp.sqrt(jnp.float32(H))
    p = jax.nn.softmax(s, axis=-1)
    ctx = jnp.einsum('tbc,tce->tbe', p, v, precision=hp)
    att = jnp.einsum('tbe,fe->tbf', ctx, params['att_w_out'],
                     precision=hp) + params['att_b_out']
    att = att + ula
    att_bf = jnp.transpose(att, (1, 0, 2))                        # (B, T, H)
    out = jnp.einsum('bth,oh->bto', att_bf, params['lin_w'],
                     precision=hp) + params['lin_b']
    return out[:, -1, :]                                          # (B, O)


if __name__ == "__main__":
    B, T = 2, 8
    input_features_num = 8
    lstm_hidden = 32
    lstm_layers = 2
    output_len = 4

    key = jax.random.PRNGKey(0)
    k_param, k_x = jax.random.split(key)
    params = init_params(k_param, input_features_num, lstm_hidden,
                         lstm_layers, output_len, B)
    input_seq = jax.random.normal(k_x, (B, T, input_features_num),
                                  dtype=jnp.float32)

    ref = jax.block_until_ready(reference_forward(params, input_seq))

    # Exact-math path (f32 MXU operands, exact softmax): tight check vs reference.
    kp_f32 = prepare_kernel_params(params, jnp.float32)
    out_f32 = jax.block_until_ready(attention_lstm_forward(kp_f32, input_seq))
    assert out_f32.shape == (B, output_len), out_f32.shape
    assert bool(jnp.all(jnp.isfinite(out_f32)))
    assert bool(jnp.max(jnp.abs(out_f32 - ref)) < 2e-2), \
        float(jnp.max(jnp.abs(out_f32 - ref)))

    # Fast path (bf16 MXU operands, f32 accumulate / f32 nonlinearities) for v6e/v7x.
    kp_bf16 = prepare_kernel_params(params, jnp.bfloat16)
    out_bf16 = jax.block_until_ready(attention_lstm_forward(kp_bf16, input_seq))
    assert out_bf16.shape == (B, output_len), out_bf16.shape
    assert bool(jnp.all(jnp.isfinite(out_bf16)))
    assert bool(jnp.max(jnp.abs(out_bf16 - ref)) < 1e-1), \
        float(jnp.max(jnp.abs(out_bf16 - ref)))

    print("KERNEL_OK")
</pallas_src>

<mosaic_0001>
module attributes {stable_mosaic.version = 11 : i64} {
  func.func @kernel(%arg0: memref<16x8xf32, #tpu.memory_space<vmem>>, %arg1: memref<8x128xf32, #tpu.memory_space<vmem>>, %arg2: memref<32x128xf32, #tpu.memory_space<vmem>>, %arg3: memref<1x128xf32, #tpu.memory_space<vmem>>, %arg4: memref<32x128xf32, #tpu.memory_space<vmem>>, %arg5: memref<32x128xf32, #tpu.memory_space<vmem>>, %arg6: memref<1x128xf32, #tpu.memory_space<vmem>>, %arg7: memref<2x2x32xf32, #tpu.memory_space<vmem>>, %arg8: memref<2x2x32xf32, #tpu.memory_space<vmem>>, %arg9: memref<32x96xf32, #tpu.memory_space<vmem>>, %arg10: memref<1x96xf32, #tpu.memory_space<vmem>>, %arg11: memref<32x32xf32, #tpu.memory_space<vmem>>, %arg12: memref<1x32xf32, #tpu.memory_space<vmem>>, %arg13: memref<32x4xf32, #tpu.memory_space<vmem>>, %arg14: memref<1x4xf32, #tpu.memory_space<vmem>>, %arg15: memref<2x4xf32, #tpu.memory_space<vmem>>) attributes {dimension_semantics = [], scalar_prefetch = 0 : i64, scratch_operands = 0 : i64, tpu.core_type = #tpu.core_type<tc>} {
    %c0 = arith.constant 0 : index
    %c0_0 = arith.constant 0 : index
    %0 = vector.load %arg1[%c0, %c0_0] : memref<8x128xf32, #tpu.memory_space<vmem>>, vector<8x128xf32>
    %c0_1 = arith.constant 0 : index
    %c0_2 = arith.constant 0 : index
    %1 = vector.load %arg3[%c0_1, %c0_2] : memref<1x128xf32, #tpu.memory_space<vmem>>, vector<1x128xf32>
    %c0_3 = arith.constant 0 : index
    %c0_4 = arith.constant 0 : index
    %2 = vector.load %arg0[%c0_3, %c0_4] : memref<16x8xf32, #tpu.memory_space<vmem>>, vector<16x8xf32>
    %cst = arith.constant dense<0.000000e+00> : vector<16x128xf32>
    %3 = tpu.matmul %2, %0, %cst {dimension_numbers = #tpu.dot_dimension_numbers<[1], [0], [0], [1], [0, 0, 1, 1], [], []>} : vector<16x8xf32>, vector<8x128xf32>, vector<16x128xf32> -> vector<16x128xf32>
    %4 = vector.broadcast %1 : vector<1x128xf32> to vector<16x128xf32>
    %5 = arith.addf %3, %4 : vector<16x128xf32>
    %c0_5 = arith.constant 0 : index
    %c0_6 = arith.constant 0 : index
    %c0_7 = arith.constant 0 : index
    %6 = vector.load %arg7[%c0_5, %c0_6, %c0_7] : memref<2x2x32xf32, #tpu.memory_space<vmem>>, vector<1x2x32xf32>
    %7 = vector.shape_cast %6 : vector<1x2x32xf32> to vector<2x32xf32>
    %c1 = arith.constant 1 : index
    %c0_8 = arith.constant 0 : index
    %c0_9 = arith.constant 0 : index
    %8 = vector.load %arg7[%c1, %c0_8, %c0_9] : memref<2x2x32xf32, #tpu.memory_space<vmem>>, vector<1x2x32xf32>
    %9 = vector.shape_cast %8 : vector<1x2x32xf32> to vector<2x32xf32>
    %c0_10 = arith.constant 0 : index
    %c0_11 = arith.constant 0 : index
    %c0_12 = arith.constant 0 : index
    %10 = vector.load %arg8[%c0_10, %c0_11, %c0_12] : memref<2x2x32xf32, #tpu.memory_space<vmem>>, vector<1x2x32xf32>
    %11 = vector.shape_cast %10 : vector<1x2x32xf32> to vector<2x32xf32>
    %c1_13 = arith.constant 1 : index
    %c0_14 = arith.constant 0 : index
    %c0_15 = arith.constant 0 : index
    %12 = vector.load %arg8[%c1_13, %c0_14, %c0_15] : memref<2x2x32xf32, #tpu.memory_space<vmem>>, vector<1x2x32xf32>
    %13 = vector.shape_cast %12 : vector<1x2x32xf32> to vector<2x32xf32>
    %14 = vector.extract_strided_slice %5 {offsets = [0, 0], sizes = [2, 128], strides = [1, 1]} : vector<16x128xf32> to vector<2x128xf32>
    %c0_16 = arith.constant 0 : index
    %c0_17 = arith.constant 0 : index
    %15 = vector.load %arg2[%c0_16, %c0_17] : memref<32x128xf32, #tpu.memory_space<vmem>>, vector<32x128xf32>
    %cst_18 = arith.constant dense<0.000000e+00> : vector<2x128xf32>
    %16 = tpu.matmul %7, %15, %cst_18 {dimension_numbers = #tpu.dot_dimension_numbers<[1], [0], [0], [1], [0, 0, 1, 1], [], []>} : vector<2x32xf32>, vector<32x128xf32>, vector<2x128xf32> -> vector<2x128xf32>
    %17 = arith.addf %14, %16 : vector<2x128xf32>
    %18 = vector.extract_strided_slice %17 {offsets = [0, 0], sizes = [2, 96], strides = [1, 1]} : vector<2x128xf32> to vector<2x96xf32>
    %19 = arith.negf %18 : vector<2x96xf32>
    %20 = math.exp %19 : vector<2x96xf32>
    %cst_19 = arith.constant 1.000000e+00 : f32
    %21 = vector.broadcast %cst_19 : f32 to vector<2x96xf32>
    %22 = arith.addf %21, %20 : vector<2x96xf32>
    %23 = arith.divf %21, %22 : vector<2x96xf32>
    %24 = vector.extract_strided_slice %17 {offsets = [0, 96], sizes = [2, 32], strides = [1, 1]} : vector<2x128xf32> to vector<2x32xf32>
    %25 = math.tanh %24 : vector<2x32xf32>
    %26 = vector.extract_strided_slice %23 {offsets = [0, 0], sizes = [2, 32], strides = [1, 1]} : vector<2x96xf32> to vector<2x32xf32>
    %27 = vector.extract_strided_slice %23 {offsets = [0, 32], sizes = [2, 32], strides = [1, 1]} : vector<2x96xf32> to vector<2x32xf32>
    %28 = vector.extract_strided_slice %23 {offsets = [0, 64], sizes = [2, 32], strides = [1, 1]} : vector<2x96xf32> to vector<2x32xf32>
    %29 = arith.mulf %27, %11 : vector<2x32xf32>
    %30 = arith.mulf %26, %25 : vector<2x32xf32>
    %31 = arith.addf %29, %30 : vector<2x32xf32>
    %32 = math.tanh %31 : vector<2x32xf32>
    %33 = arith.mulf %28, %32 : vector<2x32xf32>
    %34 = vector.extract_strided_slice %5 {offsets = [2, 0], sizes = [2, 128], strides = [1, 1]} : vector<16x128xf32> to vector<2x128xf32>
    %c0_20 = arith.constant 0 : index
    %c0_21 = arith.constant 0 : index
    %35 = vector.load %arg2[%c0_20, %c0_21] : memref<32x128xf32, #tpu.memory_space<vmem>>, vector<32x128xf32>
    %cst_22 = arith.constant dense<0.000000e+00> : vector<2x128xf32>
    %36 = tpu.matmul %33, %35, %cst_22 {dimension_numbers = #tpu.dot_dimension_numbers<[1], [0], [0], [1], [0, 0, 1, 1], [], []>} : vector<2x32xf32>, vector<32x128xf32>, vector<2x128xf32> -> vector<2x128xf32>
    %37 = arith.addf %34, %36 : vector<2x128xf32>
    %38 = vector.extract_strided_slice %37 {offsets = [0, 0], sizes = [2, 96], strides = [1, 1]} : vector<2x128xf32> to vector<2x96xf32>
    %39 = arith.negf %38 : vector<2x96xf32>
    %40 = math.exp %39 : vector<2x96xf32>
    %cst_23 = arith.constant 1.000000e+00 : f32
    %41 = vector.broadcast %cst_23 : f32 to vector<2x96xf32>
    %42 = arith.addf %41, %40 : vector<2x96xf32>
    %43 = arith.divf %41, %42 : vector<2x96xf32>
    %44 = vector.extract_strided_slice %37 {offsets = [0, 96], sizes = [2, 32], strides = [1, 1]} : vector<2x128xf32> to vector<2x32xf32>
    %45 = math.tanh %44 : vector<2x32xf32>
    %46 = vector.extract_strided_slice %43 {offsets = [0, 0], sizes = [2, 32], strides = [1, 1]} : vector<2x96xf32> to vector<2x32xf32>
    %47 = vector.extract_strided_slice %43 {offsets = [0, 32], sizes = [2, 32], strides = [1, 1]} : vector<2x96xf32> to vector<2x32xf32>
    %48 = vector.extract_strided_slice %43 {offsets = [0, 64], sizes = [2, 32], strides = [1, 1]} : vector<2x96xf32> to vector<2x32xf32>
    %49 = arith.mulf %47, %31 : vector<2x32xf32>
    %50 = arith.mulf %46, %45 : vector<2x32xf32>
    %51 = arith.addf %49, %50 : vector<2x32xf32>
    %52 = math.tanh %51 : vector<2x32xf32>
    %53 = arith.mulf %48, %52 : vector<2x32xf32>
    %c0_24 = arith.constant 0 : index
    %c0_25 = arith.constant 0 : index
    %54 = vector.load %arg4[%c0_24, %c0_25] : memref<32x128xf32, #tpu.memory_space<vmem>>, vector<32x128xf32>
    %c0_26 = arith.constant 0 : index
    %c0_27 = arith.constant 0 : index
    %55 = vector.load %arg6[%c0_26, %c0_27] : memref<1x128xf32, #tpu.memory_space<vmem>>, vector<1x128xf32>
    %cst_28 = arith.constant dense<0.000000e+00> : vector<2x128xf32>
    %56 = tpu.matmul %33, %54, %cst_28 {dimension_numbers = #tpu.dot_dimension_numbers<[1], [0], [0], [1], [0, 0, 1, 1], [], []>} : vector<2x32xf32>, vector<32x128xf32>, vector<2x128xf32> -> vector<2x128xf32>
    %57 = vector.broadcast %55 : vector<1x128xf32> to vector<2x128xf32>
    %58 = arith.addf %56, %57 : vector<2x128xf32>
    %c0_29 = arith.constant 0 : index
    %c0_30 = arith.constant 0 : index
    %59 = vector.load %arg5[%c0_29, %c0_30] : memref<32x128xf32, #tpu.memory_space<vmem>>, vector<32x128xf32>
    %cst_31 = arith.constant dense<0.000000e+00> : vector<2x128xf32>
    %60 = tpu.matmul %9, %59, %cst_31 {dimension_numbers = #tpu.dot_dimension_numbers<[1], [0], [0], [1], [0, 0, 1, 1], [], []>} : vector<2x32xf32>, vector<32x128xf32>, vector<2x128xf32> -> vector<2x128xf32>
    %61 = arith.addf %58, %60 : vector<2x128xf32>
    %62 = vector.extract_strided_slice %61 {offsets = [0, 0], sizes = [2, 96], strides = [1, 1]} : vector<2x128xf32> to vector<2x96xf32>
    %63 = arith.negf %62 : vector<2x96xf32>
    %64 = math.exp %63 : vector<2x96xf32>
    %cst_32 = arith.constant 1.000000e+00 : f32
    %65 = vector.broadcast %cst_32 : f32 to vector<2x96xf32>
    %66 = arith.addf %65, %64 : vector<2x96xf32>
    %67 = arith.divf %65, %66 : vector<2x96xf32>
    %68 = vector.extract_strided_slice %61 {offsets = [0, 96], sizes = [2, 32], strides = [1, 1]} : vector<2x128xf32> to vector<2x32xf32>
    %69 = math.tanh %68 : vector<2x32xf32>
    %70 = vector.extract_strided_slice %67 {offsets = [0, 0], sizes = [2, 32], strides = [1, 1]} : vector<2x96xf32> to vector<2x32xf32>
    %71 = vector.extract_strided_slice %67 {offsets = [0, 32], sizes = [2, 32], strides = [1, 1]} : vector<2x96xf32> to vector<2x32xf32>
    %72 = vector.extract_strided_slice %67 {offsets = [0, 64], sizes = [2, 32], strides = [1, 1]} : vector<2x96xf32> to vector<2x32xf32>
    %73 = arith.mulf %71, %13 : vector<2x32xf32>
    %74 = arith.mulf %70, %69 : vector<2x32xf32>
    %75 = arith.addf %73, %74 : vector<2x32xf32>
    %76 = math.tanh %75 : vector<2x32xf32>
    %77 = arith.mulf %72, %76 : vector<2x32xf32>
    %78 = vector.extract_strided_slice %5 {offsets = [4, 0], sizes = [2, 128], strides = [1, 1]} : vector<16x128xf32> to vector<2x128xf32>
    %c0_33 = arith.constant 0 : index
    %c0_34 = arith.constant 0 : index
    %79 = vector.load %arg2[%c0_33, %c0_34] : memref<32x128xf32, #tpu.memory_space<vmem>>, vector<32x128xf32>
    %cst_35 = arith.constant dense<0.000000e+00> : vector<2x128xf32>
    %80 = tpu.matmul %53, %79, %cst_35 {dimension_numbers = #tpu.dot_dimension_numbers<[1], [0], [0], [1], [0, 0, 1, 1], [], []>} : vector<2x32xf32>, vector<32x128xf32>, vector<2x128xf32> -> vector<2x128xf32>
    %81 = arith.addf %78, %80 : vector<2x128xf32>
    %82 = vector.extract_strided_slice %81 {offsets = [0, 0], sizes = [2, 96], strides = [1, 1]} : vector<2x128xf32> to vector<2x96xf32>
    %83 = arith.negf %82 : vector<2x96xf32>
    %84 = math.exp %83 : vector<2x96xf32>
    %cst_36 = arith.constant 1.000000e+00 : f32
    %85 = vector.broadcast %cst_36 : f32 to vector<2x96xf32>
    %86 = arith.addf %85, %84 : vector<2x96xf32>
    %87 = arith.divf %85, %86 : vector<2x96xf32>
    %88 = vector.extract_strided_slice %81 {offsets = [0, 96], sizes = [2, 32], strides = [1, 1]} : vector<2x128xf32> to vector<2x32xf32>
    %89 = math.tanh %88 : vector<2x32xf32>
    %90 = vector.extract_strided_slice %87 {offsets = [0, 0], sizes = [2, 32], strides = [1, 1]} : vector<2x96xf32> to vector<2x32xf32>
    %91 = vector.extract_strided_slice %87 {offsets = [0, 32], sizes = [2, 32], strides = [1, 1]} : vector<2x96xf32> to vector<2x32xf32>
    %92 = vector.extract_strided_slice %87 {offsets = [0, 64], sizes = [2, 32], strides = [1, 1]} : vector<2x96xf32> to vector<2x32xf32>
    %93 = arith.mulf %91, %51 : vector<2x32xf32>
    %94 = arith.mulf %90, %89 : vector<2x32xf32>
    %95 = arith.addf %93, %94 : vector<2x32xf32>
    %96 = math.tanh %95 : vector<2x32xf32>
    %97 = arith.mulf %92, %96 : vector<2x32xf32>
    %c0_37 = arith.constant 0 : index
    %c0_38 = arith.constant 0 : index
    %98 = vector.load %arg4[%c0_37, %c0_38] : memref<32x128xf32, #tpu.memory_space<vmem>>, vector<32x128xf32>
    %c0_39 = arith.constant 0 : index
    %c0_40 = arith.constant 0 : index
    %99 = vector.load %arg6[%c0_39, %c0_40] : memref<1x128xf32, #tpu.memory_space<vmem>>, vector<1x128xf32>
    %cst_41 = arith.constant dense<0.000000e+00> : vector<2x128xf32>
    %100 = tpu.matmul %53, %98, %cst_41 {dimension_numbers = #tpu.dot_dimension_numbers<[1], [0], [0], [1], [0, 0, 1, 1], [], []>} : vector<2x32xf32>, vector<32x128xf32>, vector<2x128xf32> -> vector<2x128xf32>
    %101 = vector.broadcast %99 : vector<1x128xf32> to vector<2x128xf32>
    %102 = arith.addf %100, %101 : vector<2x128xf32>
    %c0_42 = arith.constant 0 : index
    %c0_43 = arith.constant 0 : index
    %103 = vector.load %arg5[%c0_42, %c0_43] : memref<32x128xf32, #tpu.memory_space<vmem>>, vector<32x128xf32>
    %cst_44 = arith.constant dense<0.000000e+00> : vector<2x128xf32>
    %104 = tpu.matmul %77, %103, %cst_44 {dimension_numbers = #tpu.dot_dimension_numbers<[1], [0], [0], [1], [0, 0, 1, 1], [], []>} : vector<2x32xf32>, vector<32x128xf32>, vector<2x128xf32> -> vector<2x128xf32>
    %105 = arith.addf %102, %104 : vector<2x128xf32>
    %106 = vector.extract_strided_slice %105 {offsets = [0, 0], sizes = [2, 96], strides = [1, 1]} : vector<2x128xf32> to vector<2x96xf32>
    %107 = arith.negf %106 : vector<2x96xf32>
    %108 = math.exp %107 : vector<2x96xf32>
    %cst_45 = arith.constant 1.000000e+00 : f32
    %109 = vector.broadcast %cst_45 : f32 to vector<2x96xf32>
    %110 = arith.addf %109, %108 : vector<2x96xf32>
    %111 = arith.divf %109, %110 : vector<2x96xf32>
    %112 = vector.extract_strided_slice %105 {offsets = [0, 96], sizes = [2, 32], strides = [1, 1]} : vector<2x128xf32> to vector<2x32xf32>
    %113 = math.tanh %112 : vector<2x32xf32>
    %114 = vector.extract_strided_slice %111 {offsets = [0, 0], sizes = [2, 32], strides = [1, 1]} : vector<2x96xf32> to vector<2x32xf32>
    %115 = vector.extract_strided_slice %111 {offsets = [0, 32], sizes = [2, 32], strides = [1, 1]} : vector<2x96xf32> to vector<2x32xf32>
    %116 = vector.extract_strided_slice %111 {offsets = [0, 64], sizes = [2, 32], strides = [1, 1]} : vector<2x96xf32> to vector<2x32xf32>
    %117 = arith.mulf %115, %75 : vector<2x32xf32>
    %118 = arith.mulf %114, %113 : vector<2x32xf32>
    %119 = arith.addf %117, %118 : vector<2x32xf32>
    %120 = math.tanh %119 : vector<2x32xf32>
    %121 = arith.mulf %116, %120 : vector<2x32xf32>
    %122 = vector.extract_strided_slice %5 {offsets = [6, 0], sizes = [2, 128], strides = [1, 1]} : vector<16x128xf32> to vector<2x128xf32>
    %c0_46 = arith.constant 0 : index
    %c0_47 = arith.constant 0 : index
    %123 = vector.load %arg2[%c0_46, %c0_47] : memref<32x128xf32, #tpu.memory_space<vmem>>, vector<32x128xf32>
    %cst_48 = arith.constant dense<0.000000e+00> : vector<2x128xf32>
    %124 = tpu.matmul %97, %123, %cst_48 {dimension_numbers = #tpu.dot_dimension_numbers<[1], [0], [0], [1], [0, 0, 1, 1], [], []>} : vector<2x32xf32>, vector<32x128xf32>, vector<2x128xf32> -> vector<2x128xf32>
    %125 = arith.addf %122, %124 : vector<2x128xf32>
    %126 = vector.extract_strided_slice %125 {offsets = [0, 0], sizes = [2, 96], strides = [1, 1]} : vector<2x128xf32> to vector<2x96xf32>
    %127 = arith.negf %126 : vector<2x96xf32>
    %128 = math.exp %127 : vector<2x96xf32>
    %cst_49 = arith.constant 1.000000e+00 : f32
    %129 = vector.broadcast %cst_49 : f32 to vector<2x96xf32>
    %130 = arith.addf %129, %128 : vector<2x96xf32>
    %131 = arith.divf %129, %130 : vector<2x96xf32>
    %132 = vector.extract_strided_slice %125 {offsets = [0, 96], sizes = [2, 32], strides = [1, 1]} : vector<2x128xf32> to vector<2x32xf32>
    %133 = math.tanh %132 : vector<2x32xf32>
    %134 = vector.extract_strided_slice %131 {offsets = [0, 0], sizes = [2, 32], strides = [1, 1]} : vector<2x96xf32> to vector<2x32xf32>
    %135 = vector.extract_strided_slice %131 {offsets = [0, 32], sizes = [2, 32], strides = [1, 1]} : vector<2x96xf32> to vector<2x32xf32>
    %136 = vector.extract_strided_slice %131 {offsets = [0, 64], sizes = [2, 32], strides = [1, 1]} : vector<2x96xf32> to vector<2x32xf32>
    %137 = arith.mulf %135, %95 : vector<2x32xf32>
    %138 = arith.mulf %134, %133 : vector<2x32xf32>
    %139 = arith.addf %137, %138 : vector<2x32xf32>
    %140 = math.tanh %139 : vector<2x32xf32>
    %141 = arith.mulf %136, %140 : vector<2x32xf32>
    %c0_50 = arith.constant 0 : index
    %c0_51 = arith.constant 0 : index
    %142 = vector.load %arg4[%c0_50, %c0_51] : memref<32x128xf32, #tpu.memory_space<vmem>>, vector<32x128xf32>
    %c0_52 = arith.constant 0 : index
    %c0_53 = arith.constant 0 : index
    %143 = vector.load %arg6[%c0_52, %c0_53] : memref<1x128xf32, #tpu.memory_space<vmem>>, vector<1x128xf32>
    %cst_54 = arith.constant dense<0.000000e+00> : vector<2x128xf32>
    %144 = tpu.matmul %97, %142, %cst_54 {dimension_numbers = #tpu.dot_dimension_numbers<[1], [0], [0], [1], [0, 0, 1, 1], [], []>} : vector<2x32xf32>, vector<32x128xf32>, vector<2x128xf32> -> vector<2x128xf32>
    %145 = vector.broadcast %143 : vector<1x128xf32> to vector<2x128xf32>
    %146 = arith.addf %144, %145 : vector<2x128xf32>
    %c0_55 = arith.constant 0 : index
    %c0_56 = arith.constant 0 : index
    %147 = vector.load %arg5[%c0_55, %c0_56] : memref<32x128xf32, #tpu.memory_space<vmem>>, vector<32x128xf32>
    %cst_57 = arith.constant dense<0.000000e+00> : vector<2x128xf32>
    %148 = tpu.matmul %121, %147, %cst_57 {dimension_numbers = #tpu.dot_dimension_numbers<[1], [0], [0], [1], [0, 0, 1, 1], [], []>} : vector<2x32xf32>, vector<32x128xf32>, vector<2x128xf32> -> vector<2x128xf32>
    %149 = arith.addf %146, %148 : vector<2x128xf32>
    %150 = vector.extract_strided_slice %149 {offsets = [0, 0], sizes = [2, 96], strides = [1, 1]} : vector<2x128xf32> to vector<2x96xf32>
    %151 = arith.negf %150 : vector<2x96xf32>
    %152 = math.exp %151 : vector<2x96xf32>
    %cst_58 = arith.constant 1.000000e+00 : f32
    %153 = vector.broadcast %cst_58 : f32 to vector<2x96xf32>
    %154 = arith.addf %153, %152 : vector<2x96xf32>
    %155 = arith.divf %153, %154 : vector<2x96xf32>
    %156 = vector.extract_strided_slice %149 {offsets = [0, 96], sizes = [2, 32], strides = [1, 1]} : vector<2x128xf32> to vector<2x32xf32>
    %157 = math.tanh %156 : vector<2x32xf32>
    %158 = vector.extract_strided_slice %155 {offsets = [0, 0], sizes = [2, 32], strides = [1, 1]} : vector<2x96xf32> to vector<2x32xf32>
    %159 = vector.extract_strided_slice %155 {offsets = [0, 32], sizes = [2, 32], strides = [1, 1]} : vector<2x96xf32> to vector<2x32xf32>
    %160 = vector.extract_strided_slice %155 {offsets = [0, 64], sizes = [2, 32], strides = [1, 1]} : vector<2x96xf32> to vector<2x32xf32>
    %161 = arith.mulf %159, %119 : vector<2x32xf32>
    %162 = arith.mulf %158, %157 : vector<2x32xf32>
    %163 = arith.addf %161, %162 : vector<2x32xf32>
    %164 = math.tanh %163 : vector<2x32xf32>
    %165 = arith.mulf %160, %164 : vector<2x32xf32>
    %166 = vector.extract_strided_slice %5 {offsets = [8, 0], sizes = [2, 128], strides = [1, 1]} : vector<16x128xf32> to vector<2x128xf32>
    %c0_59 = arith.constant 0 : index
    %c0_60 = arith.constant 0 : index
    %167 = vector.load %arg2[%c0_59, %c0_60] : memref<32x128xf32, #tpu.memory_space<vmem>>, vector<32x128xf32>
    %cst_61 = arith.constant dense<0.000000e+00> : vector<2x128xf32>
    %168 = tpu.matmul %141, %167, %cst_61 {dimension_numbers = #tpu.dot_dimension_numbers<[1], [0], [0], [1], [0, 0, 1, 1], [], []>} : vector<2x32xf32>, vector<32x128xf32>, vector<2x128xf32> -> vector<2x128xf32>
    %169 = arith.addf %166, %168 : vector<2x128xf32>
    %170 = vector.extract_strided_slice %169 {offsets = [0, 0], sizes = [2, 96], strides = [1, 1]} : vector<2x128xf32> to vector<2x96xf32>
    %171 = arith.negf %170 : vector<2x96xf32>
    %172 = math.exp %171 : vector<2x96xf32>
    %cst_62 = arith.constant 1.000000e+00 : f32
    %173 = vector.broadcast %cst_62 : f32 to vector<2x96xf32>
    %174 = arith.addf %173, %172 : vector<2x96xf32>
    %175 = arith.divf %173, %174 : vector<2x96xf32>
    %176 = vector.extract_strided_slice %169 {offsets = [0, 96], sizes = [2, 32], strides = [1, 1]} : vector<2x128xf32> to vector<2x32xf32>
    %177 = math.tanh %176 : vector<2x32xf32>
    %178 = vector.extract_strided_slice %175 {offsets = [0, 0], sizes = [2, 32], strides = [1, 1]} : vector<2x96xf32> to vector<2x32xf32>
    %179 = vector.extract_strided_slice %175 {offsets = [0, 32], sizes = [2, 32], strides = [1, 1]} : vector<2x96xf32> to vector<2x32xf32>
    %180 = vector.extract_strided_slice %175 {offsets = [0, 64], sizes = [2, 32], strides = [1, 1]} : vector<2x96xf32> to vector<2x32xf32>
    %181 = arith.mulf %179, %139 : vector<2x32xf32>
    %182 = arith.mulf %178, %177 : vector<2x32xf32>
    %183 = arith.addf %181, %182 : vector<2x32xf32>
    %184 = math.tanh %183 : vector<2x32xf32>
    %185 = arith.mulf %180, %184 : vector<2x32xf32>
    %c0_63 = arith.constant 0 : index
    %c0_64 = arith.constant 0 : index
    %186 = vector.load %arg4[%c0_63, %c0_64] : memref<32x128xf32, #tpu.memory_space<vmem>>, vector<32x128xf32>
    %c0_65 = arith.constant 0 : index
    %c0_66 = arith.constant 0 : index
    %187 = vector.load %arg6[%c0_65, %c0_66] : memref<1x128xf32, #tpu.memory_space<vmem>>, vector<1x128xf32>
    %cst_67 = arith.constant dense<0.000000e+00> : vector<2x128xf32>
    %188 = tpu.matmul %141, %186, %cst_67 {dimension_numbers = #tpu.dot_dimension_numbers<[1], [0], [0], [1], [0, 0, 1, 1], [], []>} : vector<2x32xf32>, vector<32x128xf32>, vector<2x128xf32> -> vector<2x128xf32>
    %189 = vector.broadcast %187 : vector<1x128xf32> to vector<2x128xf32>
    %190 = arith.addf %188, %189 : vector<2x128xf32>
    %c0_68 = arith.constant 0 : index
    %c0_69 = arith.constant 0 : index
    %191 = vector.load %arg5[%c0_68, %c0_69] : memref<32x128xf32, #tpu.memory_space<vmem>>, vector<32x128xf32>
    %cst_70 = arith.constant dense<0.000000e+00> : vector<2x128xf32>
    %192 = tpu.matmul %165, %191, %cst_70 {dimension_numbers = #tpu.dot_dimension_numbers<[1], [0], [0], [1], [0, 0, 1, 1], [], []>} : vector<2x32xf32>, vector<32x128xf32>, vector<2x128xf32> -> vector<2x128xf32>
    %193 = arith.addf %190, %192 : vector<2x128xf32>
    %194 = vector.extract_strided_slice %193 {offsets = [0, 0], sizes = [2, 96], strides = [1, 1]} : vector<2x128xf32> to vector<2x96xf32>
    %195 = arith.negf %194 : vector<2x96xf32>
    %196 = math.exp %195 : vector<2x96xf32>
    %cst_71 = arith.constant 1.000000e+00 : f32
    %197 = vector.broadcast %cst_71 : f32 to vector<2x96xf32>
    %198 = arith.addf %197, %196 : vector<2x96xf32>
    %199 = arith.divf %197, %198 : vector<2x96xf32>
    %200 = vector.extract_strided_slice %193 {offsets = [0, 96], sizes = [2, 32], strides = [1, 1]} : vector<2x128xf32> to vector<2x32xf32>
    %201 = math.tanh %200 : vector<2x32xf32>
    %202 = vector.extract_strided_slice %199 {offsets = [0, 0], sizes = [2, 32], strides = [1, 1]} : vector<2x96xf32> to vector<2x32xf32>
    %203 = vector.extract_strided_slice %199 {offsets = [0, 32], sizes = [2, 32], strides = [1, 1]} : vector<2x96xf32> to vector<2x32xf32>
    %204 = vector.extract_strided_slice %199 {offsets = [0, 64], sizes = [2, 32], strides = [1, 1]} : vector<2x96xf32> to vector<2x32xf32>
    %205 = arith.mulf %203, %163 : vector<2x32xf32>
    %206 = arith.mulf %202, %201 : vector<2x32xf32>
    %207 = arith.addf %205, %206 : vector<2x32xf32>
    %208 = math.tanh %207 : vector<2x32xf32>
    %209 = arith.mulf %204, %208 : vector<2x32xf32>
    %210 = vector.extract_strided_slice %5 {offsets = [10, 0], sizes = [2, 128], strides = [1, 1]} : vector<16x128xf32> to vector<2x128xf32>
    %c0_72 = arith.constant 0 : index
    %c0_73 = arith.constant 0 : index
    %211 = vector.load %arg2[%c0_72, %c0_73] : memref<32x128xf32, #tpu.memory_space<vmem>>, vector<32x128xf32>
    %cst_74 = arith.constant dense<0.000000e+00> : vector<2x128xf32>
    %212 = tpu.matmul %185, %211, %cst_74 {dimension_numbers = #tpu.dot_dimension_numbers<[1], [0], [0], [1], [0, 0, 1, 1], [], []>} : vector<2x32xf32>, vector<32x128xf32>, vector<2x128xf32> -> vector<2x128xf32>
    %213 = arith.addf %210, %212 : vector<2x128xf32>
    %214 = vector.extract_strided_slice %213 {offsets = [0, 0], sizes = [2, 96], strides = [1, 1]} : vector<2x128xf32> to vector<2x96xf32>
    %215 = arith.negf %214 : vector<2x96xf32>
    %216 = math.exp %215 : vector<2x96xf32>
    %cst_75 = arith.constant 1.000000e+00 : f32
    %217 = vector.broadcast %cst_75 : f32 to vector<2x96xf32>
    %218 = arith.addf %217, %216 : vector<2x96xf32>
    %219 = arith.divf %217, %218 : vector<2x96xf32>
    %220 = vector.extract_strided_slice %213 {offsets = [0, 96], sizes = [2, 32], strides = [1, 1]} : vector<2x128xf32> to vector<2x32xf32>
    %221 = math.tanh %220 : vector<2x32xf32>
    %222 = vector.extract_strided_slice %219 {offsets = [0, 0], sizes = [2, 32], strides = [1, 1]} : vector<2x96xf32> to vector<2x32xf32>
    %223 = vector.extract_strided_slice %219 {offsets = [0, 32], sizes = [2, 32], strides = [1, 1]} : vector<2x96xf32> to vector<2x32xf32>
    %224 = vector.extract_strided_slice %219 {offsets = [0, 64], sizes = [2, 32], strides = [1, 1]} : vector<2x96xf32> to vector<2x32xf32>
    %225 = arith.mulf %223, %183 : vector<2x32xf32>
    %226 = arith.mulf %222, %221 : vector<2x32xf32>
    %227 = arith.addf %225, %226 : vector<2x32xf32>
    %228 = math.tanh %227 : vector<2x32xf32>
    %229 = arith.mulf %224, %228 : vector<2x32xf32>
    %c0_76 = arith.constant 0 : index
    %c0_77 = arith.constant 0 : index
    %230 = vector.load %arg4[%c0_76, %c0_77] : memref<32x128xf32, #tpu.memory_space<vmem>>, vector<32x128xf32>
    %c0_78 = arith.constant 0 : index
    %c0_79 = arith.constant 0 : index
    %231 = vector.load %arg6[%c0_78, %c0_79] : memref<1x128xf32, #tpu.memory_space<vmem>>, vector<1x128xf32>
    %cst_80 = arith.constant dense<0.000000e+00> : vector<2x128xf32>
    %232 = tpu.matmul %185, %230, %cst_80 {dimension_numbers = #tpu.dot_dimension_numbers<[1], [0], [0], [1], [0, 0, 1, 1], [], []>} : vector<2x32xf32>, vector<32x128xf32>, vector<2x128xf32> -> vector<2x128xf32>
    %233 = vector.broadcast %231 : vector<1x128xf32> to vector<2x128xf32>
    %234 = arith.addf %232, %233 : vector<2x128xf32>
    %c0_81 = arith.constant 0 : index
    %c0_82 = arith.constant 0 : index
    %235 = vector.load %arg5[%c0_81, %c0_82] : memref<32x128xf32, #tpu.memory_space<vmem>>, vector<32x128xf32>
    %cst_83 = arith.constant dense<0.000000e+00> : vector<2x128xf32>
    %236 = tpu.matmul %209, %235, %cst_83 {dimension_numbers = #tpu.dot_dimension_numbers<[1], [0], [0], [1], [0, 0, 1, 1], [], []>} : vector<2x32xf32>, vector<32x128xf32>, vector<2x128xf32> -> vector<2x128xf32>
    %237 = arith.addf %234, %236 : vector<2x128xf32>
    %238 = vector.extract_strided_slice %237 {offsets = [0, 0], sizes = [2, 96], strides = [1, 1]} : vector<2x128xf32> to vector<2x96xf32>
    %239 = arith.negf %238 : vector<2x96xf32>
    %240 = math.exp %239 : vector<2x96xf32>
    %cst_84 = arith.constant 1.000000e+00 : f32
    %241 = vector.broadcast %cst_84 : f32 to vector<2x96xf32>
    %242 = arith.addf %241, %240 : vector<2x96xf32>
    %243 = arith.divf %241, %242 : vector<2x96xf32>
    %244 = vector.extract_strided_slice %237 {offsets = [0, 96], sizes = [2, 32], strides = [1, 1]} : vector<2x128xf32> to vector<2x32xf32>
    %245 = math.tanh %244 : vector<2x32xf32>
    %246 = vector.extract_strided_slice %243 {offsets = [0, 0], sizes = [2, 32], strides = [1, 1]} : vector<2x96xf32> to vector<2x32xf32>
    %247 = vector.extract_strided_slice %243 {offsets = [0, 32], sizes = [2, 32], strides = [1, 1]} : vector<2x96xf32> to vector<2x32xf32>
    %248 = vector.extract_strided_slice %243 {offsets = [0, 64], sizes = [2, 32], strides = [1, 1]} : vector<2x96xf32> to vector<2x32xf32>
    %249 = arith.mulf %247, %207 : vector<2x32xf32>
    %250 = arith.mulf %246, %245 : vector<2x32xf32>
    %251 = arith.addf %249, %250 : vector<2x32xf32>
    %252 = math.tanh %251 : vector<2x32xf32>
    %253 = arith.mulf %248, %252 : vector<2x32xf32>
    %254 = vector.extract_strided_slice %5 {offsets = [12, 0], sizes = [2, 128], strides = [1, 1]} : vector<16x128xf32> to vector<2x128xf32>
    %c0_85 = arith.constant 0 : index
    %c0_86 = arith.constant 0 : index
    %255 = vector.load %arg2[%c0_85, %c0_86] : memref<32x128xf32, #tpu.memory_space<vmem>>, vector<32x128xf32>
    %cst_87 = arith.constant dense<0.000000e+00> : vector<2x128xf32>
    %256 = tpu.matmul %229, %255, %cst_87 {dimension_numbers = #tpu.dot_dimension_numbers<[1], [0], [0], [1], [0, 0, 1, 1], [], []>} : vector<2x32xf32>, vector<32x128xf32>, vector<2x128xf32> -> vector<2x128xf32>
    %257 = arith.addf %254, %256 : vector<2x128xf32>
    %258 = vector.extract_strided_slice %257 {offsets = [0, 0], sizes = [2, 96], strides = [1, 1]} : vector<2x128xf32> to vector<2x96xf32>
    %259 = arith.negf %258 : vector<2x96xf32>
    %260 = math.exp %259 : vector<2x96xf32>
    %cst_88 = arith.constant 1.000000e+00 : f32
    %261 = vector.broadcast %cst_88 : f32 to vector<2x96xf32>
    %262 = arith.addf %261, %260 : vector<2x96xf32>
    %263 = arith.divf %261, %262 : vector<2x96xf32>
    %264 = vector.extract_strided_slice %257 {offsets = [0, 96], sizes = [2, 32], strides = [1, 1]} : vector<2x128xf32> to vector<2x32xf32>
    %265 = math.tanh %264 : vector<2x32xf32>
    %266 = vector.extract_strided_slice %263 {offsets = [0, 0], sizes = [2, 32], strides = [1, 1]} : vector<2x96xf32> to vector<2x32xf32>
    %267 = vector.extract_strided_slice %263 {offsets = [0, 32], sizes = [2, 32], strides = [1, 1]} : vector<2x96xf32> to vector<2x32xf32>
    %268 = vector.extract_strided_slice %263 {offsets = [0, 64], sizes = [2, 32], strides = [1, 1]} : vector<2x96xf32> to vector<2x32xf32>
    %269 = arith.mulf %267, %227 : vector<2x32xf32>
    %270 = arith.mulf %266, %265 : vector<2x32xf32>
    %271 = arith.addf %269, %270 : vector<2x32xf32>
    %272 = math.tanh %271 : vector<2x32xf32>
    %273 = arith.mulf %268, %272 : vector<2x32xf32>
    %c0_89 = arith.constant 0 : index
    %c0_90 = arith.constant 0 : index
    %274 = vector.load %arg4[%c0_89, %c0_90] : memref<32x128xf32, #tpu.memory_space<vmem>>, vector<32x128xf32>
    %c0_91 = arith.constant 0 : index
    %c0_92 = arith.constant 0 : index
    %275 = vector.load %arg6[%c0_91, %c0_92] : memref<1x128xf32, #tpu.memory_space<vmem>>, vector<1x128xf32>
    %cst_93 = arith.constant dense<0.000000e+00> : vector<2x128xf32>
    %276 = tpu.matmul %229, %274, %cst_93 {dimension_numbers = #tpu.dot_dimension_numbers<[1], [0], [0], [1], [0, 0, 1, 1], [], []>} : vector<2x32xf32>, vector<32x128xf32>, vector<2x128xf32> -> vector<2x128xf32>
    %277 = vector.broadcast %275 : vector<1x128xf32> to vector<2x128xf32>
    %278 = arith.addf %276, %277 : vector<2x128xf32>
    %c0_94 = arith.constant 0 : index
    %c0_95 = arith.constant 0 : index
    %279 = vector.load %arg5[%c0_94, %c0_95] : memref<32x128xf32, #tpu.memory_space<vmem>>, vector<32x128xf32>
    %cst_96 = arith.constant dense<0.000000e+00> : vector<2x128xf32>
    %280 = tpu.matmul %253, %279, %cst_96 {dimension_numbers = #tpu.dot_dimension_numbers<[1], [0], [0], [1], [0, 0, 1, 1], [], []>} : vector<2x32xf32>, vector<32x128xf32>, vector<2x128xf32> -> vector<2x128xf32>
    %281 = arith.addf %278, %280 : vector<2x128xf32>
    %282 = vector.extract_strided_slice %281 {offsets = [0, 0], sizes = [2, 96], strides = [1, 1]} : vector<2x128xf32> to vector<2x96xf32>
    %283 = arith.negf %282 : vector<2x96xf32>
    %284 = math.exp %283 : vector<2x96xf32>
    %cst_97 = arith.constant 1.000000e+00 : f32
    %285 = vector.broadcast %cst_97 : f32 to vector<2x96xf32>
    %286 = arith.addf %285, %284 : vector<2x96xf32>
    %287 = arith.divf %285, %286 : vector<2x96xf32>
    %288 = vector.extract_strided_slice %281 {offsets = [0, 96], sizes = [2, 32], strides = [1, 1]} : vector<2x128xf32> to vector<2x32xf32>
    %289 = math.tanh %288 : vector<2x32xf32>
    %290 = vector.extract_strided_slice %287 {offsets = [0, 0], sizes = [2, 32], strides = [1, 1]} : vector<2x96xf32> to vector<2x32xf32>
    %291 = vector.extract_strided_slice %287 {offsets = [0, 32], sizes = [2, 32], strides = [1, 1]} : vector<2x96xf32> to vector<2x32xf32>
    %292 = vector.extract_strided_slice %287 {offsets = [0, 64], sizes = [2, 32], strides = [1, 1]} : vector<2x96xf32> to vector<2x32xf32>
    %293 = arith.mulf %291, %251 : vector<2x32xf32>
    %294 = arith.mulf %290, %289 : vector<2x32xf32>
    %295 = arith.addf %293, %294 : vector<2x32xf32>
    %296 = math.tanh %295 : vector<2x32xf32>
    %297 = arith.mulf %292, %296 : vector<2x32xf32>
    %298 = vector.extract_strided_slice %5 {offsets = [14, 0], sizes = [2, 128], strides = [1, 1]} : vector<16x128xf32> to vector<2x128xf32>
    %c0_98 = arith.constant 0 : index
    %c0_99 = arith.constant 0 : index
    %299 = vector.load %arg2[%c0_98, %c0_99] : memref<32x128xf32, #tpu.memory_space<vmem>>, vector<32x128xf32>
    %cst_100 = arith.constant dense<0.000000e+00> : vector<2x128xf32>
    %300 = tpu.matmul %273, %299, %cst_100 {dimension_numbers = #tpu.dot_dimension_numbers<[1], [0], [0], [1], [0, 0, 1, 1], [], []>} : vector<2x32xf32>, vector<32x128xf32>, vector<2x128xf32> -> vector<2x128xf32>
    %301 = arith.addf %298, %300 : vector<2x128xf32>
    %302 = vector.extract_strided_slice %301 {offsets = [0, 0], sizes = [2, 96], strides = [1, 1]} : vector<2x128xf32> to vector<2x96xf32>
    %303 = arith.negf %302 : vector<2x96xf32>
    %304 = math.exp %303 : vector<2x96xf32>
    %cst_101 = arith.constant 1.000000e+00 : f32
    %305 = vector.broadcast %cst_101 : f32 to vector<2x96xf32>
    %306 = arith.addf %305, %304 : vector<2x96xf32>
    %307 = arith.divf %305, %306 : vector<2x96xf32>
    %308 = vector.extract_strided_slice %301 {offsets = [0, 96], sizes = [2, 32], strides = [1, 1]} : vector<2x128xf32> to vector<2x32xf32>
    %309 = math.tanh %308 : vector<2x32xf32>
    %310 = vector.extract_strided_slice %307 {offsets = [0, 0], sizes = [2, 32], strides = [1, 1]} : vector<2x96xf32> to vector<2x32xf32>
    %311 = vector.extract_strided_slice %307 {offsets = [0, 32], sizes = [2, 32], strides = [1, 1]} : vector<2x96xf32> to vector<2x32xf32>
    %312 = vector.extract_strided_slice %307 {offsets = [0, 64], sizes = [2, 32], strides = [1, 1]} : vector<2x96xf32> to vector<2x32xf32>
    %313 = arith.mulf %311, %271 : vector<2x32xf32>
    %314 = arith.mulf %310, %309 : vector<2x32xf32>
    %315 = arith.addf %313, %314 : vector<2x32xf32>
    %316 = math.tanh %315 : vector<2x32xf32>
    %317 = arith.mulf %312, %316 : vector<2x32xf32>
    %c0_102 = arith.constant 0 : index
    %c0_103 = arith.constant 0 : index
    %318 = vector.load %arg4[%c0_102, %c0_103] : memref<32x128xf32, #tpu.memory_space<vmem>>, vector<32x128xf32>
    %c0_104 = arith.constant 0 : index
    %c0_105 = arith.constant 0 : index
    %319 = vector.load %arg6[%c0_104, %c0_105] : memref<1x128xf32, #tpu.memory_space<vmem>>, vector<1x128xf32>
    %cst_106 = arith.constant dense<0.000000e+00> : vector<2x128xf32>
    %320 = tpu.matmul %273, %318, %cst_106 {dimension_numbers = #tpu.dot_dimension_numbers<[1], [0], [0], [1], [0, 0, 1, 1], [], []>} : vector<2x32xf32>, vector<32x128xf32>, vector<2x128xf32> -> vector<2x128xf32>
    %321 = vector.broadcast %319 : vector<1x128xf32> to vector<2x128xf32>
    %322 = arith.addf %320, %321 : vector<2x128xf32>
    %c0_107 = arith.constant 0 : index
    %c0_108 = arith.constant 0 : index
    %323 = vector.load %arg5[%c0_107, %c0_108] : memref<32x128xf32, #tpu.memory_space<vmem>>, vector<32x128xf32>
    %cst_109 = arith.constant dense<0.000000e+00> : vector<2x128xf32>
    %324 = tpu.matmul %297, %323, %cst_109 {dimension_numbers = #tpu.dot_dimension_numbers<[1], [0], [0], [1], [0, 0, 1, 1], [], []>} : vector<2x32xf32>, vector<32x128xf32>, vector<2x128xf32> -> vector<2x128xf32>
    %325 = arith.addf %322, %324 : vector<2x128xf32>
    %326 = vector.extract_strided_slice %325 {offsets = [0, 0], sizes = [2, 96], strides = [1, 1]} : vector<2x128xf32> to vector<2x96xf32>
    %327 = arith.negf %326 : vector<2x96xf32>
    %328 = math.exp %327 : vector<2x96xf32>
    %cst_110 = arith.constant 1.000000e+00 : f32
    %329 = vector.broadcast %cst_110 : f32 to vector<2x96xf32>
    %330 = arith.addf %329, %328 : vector<2x96xf32>
    %331 = arith.divf %329, %330 : vector<2x96xf32>
    %332 = vector.extract_strided_slice %325 {offsets = [0, 96], sizes = [2, 32], strides = [1, 1]} : vector<2x128xf32> to vector<2x32xf32>
    %333 = math.tanh %332 : vector<2x32xf32>
    %334 = vector.extract_strided_slice %331 {offsets = [0, 0], sizes = [2, 32], strides = [1, 1]} : vector<2x96xf32> to vector<2x32xf32>
    %335 = vector.extract_strided_slice %331 {offsets = [0, 32], sizes = [2, 32], strides = [1, 1]} : vector<2x96xf32> to vector<2x32xf32>
    %336 = vector.extract_strided_slice %331 {offsets = [0, 64], sizes = [2, 32], strides = [1, 1]} : vector<2x96xf32> to vector<2x32xf32>
    %337 = arith.mulf %335, %295 : vector<2x32xf32>
    %338 = arith.mulf %334, %333 : vector<2x32xf32>
    %339 = arith.addf %337, %338 : vector<2x32xf32>
    %340 = math.tanh %339 : vector<2x32xf32>
    %341 = arith.mulf %336, %340 : vector<2x32xf32>
    %c0_111 = arith.constant 0 : index
    %c0_112 = arith.constant 0 : index
    %342 = vector.load %arg4[%c0_111, %c0_112] : memref<32x128xf32, #tpu.memory_space<vmem>>, vector<32x128xf32>
    %c0_113 = arith.constant 0 : index
    %c0_114 = arith.constant 0 : index
    %343 = vector.load %arg6[%c0_113, %c0_114] : memref<1x128xf32, #tpu.memory_space<vmem>>, vector<1x128xf32>
    %cst_115 = arith.constant dense<0.000000e+00> : vector<2x128xf32>
    %344 = tpu.matmul %317, %342, %cst_115 {dimension_numbers = #tpu.dot_dimension_numbers<[1], [0], [0], [1], [0, 0, 1, 1], [], []>} : vector<2x32xf32>, vector<32x128xf32>, vector<2x128xf32> -> vector<2x128xf32>
    %345 = vector.broadcast %343 : vector<1x128xf32> to vector<2x128xf32>
    %346 = arith.addf %344, %345 : vector<2x128xf32>
    %c0_116 = arith.constant 0 : index
    %c0_117 = arith.constant 0 : index
    %347 = vector.load %arg5[%c0_116, %c0_117] : memref<32x128xf32, #tpu.memory_space<vmem>>, vector<32x128xf32>
    %cst_118 = arith.constant dense<0.000000e+00> : vector<2x128xf32>
    %348 = tpu.matmul %341, %347, %cst_118 {dimension_numbers = #tpu.dot_dimension_numbers<[1], [0], [0], [1], [0, 0, 1, 1], [], []>} : vector<2x32xf32>, vector<32x128xf32>, vector<2x128xf32> -> vector<2x128xf32>
    %349 = arith.addf %346, %348 : vector<2x128xf32>
    %350 = vector.extract_strided_slice %349 {offsets = [0, 0], sizes = [2, 96], strides = [1, 1]} : vector<2x128xf32> to vector<2x96xf32>
    %351 = arith.negf %350 : vector<2x96xf32>
    %352 = math.exp %351 : vector<2x96xf32>
    %cst_119 = arith.constant 1.000000e+00 : f32
    %353 = vector.broadcast %cst_119 : f32 to vector<2x96xf32>
    %354 = arith.addf %353, %352 : vector<2x96xf32>
    %355 = arith.divf %353, %354 : vector<2x96xf32>
    %356 = vector.extract_strided_slice %349 {offsets = [0, 96], sizes = [2, 32], strides = [1, 1]} : vector<2x128xf32> to vector<2x32xf32>
    %357 = math.tanh %356 : vector<2x32xf32>
    %358 = vector.extract_strided_slice %355 {offsets = [0, 0], sizes = [2, 32], strides = [1, 1]} : vector<2x96xf32> to vector<2x32xf32>
    %359 = vector.extract_strided_slice %355 {offsets = [0, 32], sizes = [2, 32], strides = [1, 1]} : vector<2x96xf32> to vector<2x32xf32>
    %360 = vector.extract_strided_slice %355 {offsets = [0, 64], sizes = [2, 32], strides = [1, 1]} : vector<2x96xf32> to vector<2x32xf32>
    %361 = arith.mulf %359, %339 : vector<2x32xf32>
    %362 = arith.mulf %358, %357 : vector<2x32xf32>
    %363 = arith.addf %361, %362 : vector<2x32xf32>
    %364 = math.tanh %363 : vector<2x32xf32>
    %365 = arith.mulf %360, %364 : vector<2x32xf32>
    %c0_120 = arith.constant 0 : index
    %c0_121 = arith.constant 0 : index
    %366 = vector.load %arg9[%c0_120, %c0_121] : memref<32x96xf32, #tpu.memory_space<vmem>>, vector<32x96xf32>
    %cst_122 = arith.constant dense<0.000000e+00> : vector<2x96xf32>
    %367 = tpu.matmul %365, %366, %cst_122 {dimension_numbers = #tpu.dot_dimension_numbers<[1], [0], [0], [1], [0, 0, 1, 1], [], []>} : vector<2x32xf32>, vector<32x96xf32>, vector<2x96xf32> -> vector<2x96xf32>
    %c0_123 = arith.constant 0 : index
    %c0_124 = arith.constant 0 : index
    %368 = vector.load %arg10[%c0_123, %c0_124] : memref<1x96xf32, #tpu.memory_space<vmem>>, vector<1x96xf32>
    %369 = vector.broadcast %368 : vector<1x96xf32> to vector<2x96xf32>
    %370 = arith.addf %367, %369 : vector<2x96xf32>
    %371 = vector.extract_strided_slice %370 {offsets = [0, 0], sizes = [2, 32], strides = [1, 1]} : vector<2x96xf32> to vector<2x32xf32>
    %372 = vector.extract_strided_slice %370 {offsets = [0, 32], sizes = [2, 32], strides = [1, 1]} : vector<2x96xf32> to vector<2x32xf32>
    %373 = vector.extract_strided_slice %370 {offsets = [0, 64], sizes = [2, 32], strides = [1, 1]} : vector<2x96xf32> to vector<2x32xf32>
    %cst_125 = arith.constant dense<0.000000e+00> : vector<2x2xf32>
    %374 = tpu.matmul %371, %372, %cst_125 {dimension_numbers = #tpu.dot_dimension_numbers<[1], [1], [0], [0], [0, 0, 1, 0], [], []>} : vector<2x32xf32>, vector<2x32xf32>, vector<2x2xf32> -> vector<2x2xf32>
    %cst_126 = arith.constant 0.176776692 : f32
    %375 = vector.broadcast %cst_126 : f32 to vector<2x2xf32>
    %376 = arith.mulf %374, %375 : vector<2x2xf32>
    %cst_127 = arith.constant dense<0xFF800000> : vector<2xf32>
    %377 = vector.multi_reduction <maximumf>, %376, %cst_127 [1] : vector<2x2xf32> to vector<2xf32>
    %378 = vector.shape_cast %377 : vector<2xf32> to vector<2x1xf32>
    %379 = vector.broadcast %378 : vector<2x1xf32> to vector<2x2xf32>
    %380 = arith.subf %376, %379 : vector<2x2xf32>
    %381 = math.exp %380 : vector<2x2xf32>
    %cst_128 = arith.constant dense<0.000000e+00> : vector<2xf32>
    %382 = vector.multi_reduction <add>, %381, %cst_128 [1] : vector<2x2xf32> to vector<2xf32>
    %383 = vector.shape_cast %382 : vector<2xf32> to vector<2x1xf32>
    %384 = vector.broadcast %383 : vector<2x1xf32> to vector<2x2xf32>
    %385 = arith.divf %381, %384 : vector<2x2xf32>
    %cst_129 = arith.constant dense<0.000000e+00> : vector<2x32xf32>
    %386 = tpu.matmul %385, %373, %cst_129 {dimension_numbers = #tpu.dot_dimension_numbers<[1], [0], [0], [1], [0, 0, 1, 1], [], []>} : vector<2x2xf32>, vector<2x32xf32>, vector<2x32xf32> -> vector<2x32xf32>
    %c0_130 = arith.constant 0 : index
    %c0_131 = arith.constant 0 : index
    %387 = vector.load %arg11[%c0_130, %c0_131] : memref<32x32xf32, #tpu.memory_space<vmem>>, vector<32x32xf32>
    %cst_132 = arith.constant dense<0.000000e+00> : vector<2x32xf32>
    %388 = tpu.matmul %386, %387, %cst_132 {dimension_numbers = #tpu.dot_dimension_numbers<[1], [0], [0], [1], [0, 0, 1, 1], [], []>} : vector<2x32xf32>, vector<32x32xf32>, vector<2x32xf32> -> vector<2x32xf32>
    %c0_133 = arith.constant 0 : index
    %c0_134 = arith.constant 0 : index
    %389 = vector.load %arg12[%c0_133, %c0_134] : memref<1x32xf32, #tpu.memory_space<vmem>>, vector<1x32xf32>
    %390 = vector.broadcast %389 : vector<1x32xf32> to vector<2x32xf32>
    %391 = arith.addf %388, %390 : vector<2x32xf32>
    %392 = arith.addf %391, %365 : vector<2x32xf32>
    %c0_135 = arith.constant 0 : index
    %c0_136 = arith.constant 0 : index
    %393 = vector.load %arg13[%c0_135, %c0_136] : memref<32x4xf32, #tpu.memory_space<vmem>>, vector<32x4xf32>
    %cst_137 = arith.constant dense<0.000000e+00> : vector<2x4xf32>
    %394 = tpu.matmul %392, %393, %cst_137 {dimension_numbers = #tpu.dot_dimension_numbers<[1], [0], [0], [1], [0, 0, 1, 1], [], []>} : vector<2x32xf32>, vector<32x4xf32>, vector<2x4xf32> -> vector<2x4xf32>
    %c0_138 = arith.constant 0 : index
    %c0_139 = arith.constant 0 : index
    %395 = vector.load %arg14[%c0_138, %c0_139] : memref<1x4xf32, #tpu.memory_space<vmem>>, vector<1x4xf32>
    %396 = vector.broadcast %395 : vector<1x4xf32> to vector<2x4xf32>
    %397 = arith.addf %394, %396 : vector<2x4xf32>
    %c0_140 = arith.constant 0 : index
    %c0_141 = arith.constant 0 : index
    %398 = vector.load %arg15[%c0_140, %c0_141] : memref<2x4xf32, #tpu.memory_space<vmem>>, vector<2x4xf32>
    tpu.vector_store %arg15[%c0_140, %c0_141], %397 {strides = array<i32>} : memref<2x4xf32, #tpu.memory_space<vmem>>, vector<2x4xf32>,
    return
  }
}

</mosaic_0001>

<bundles_post_ra>
// kernel: tpu_custom_call.1
= control target key start
LH: loop header
LB: loop body
LE: loop exit
PB: predicated region body
PF: predicated region fallthrough
CT: control target
= control target key end

     0   :  { %20 = vsyncpa [#allocation3], 0  ;;  %s2396_s0 = inlined_call_operand.vmem [shape: f32[16,8], index: 0, kind: input, shape index: {}]   ;;  %s2397_s1 = inlined_call_operand.vmem [shape: f32[8,128], index: 1, kind: input, shape index: {}]   ;;  %s2398_s2 = inlined_call_operand.vmem [shape: f32[32,128], index: 2, kind: input, shape index: {}]   ;;  %s2399_s3 = inlined_call_operand.vmem [shape: f32[1,128], index: 3, kind: input, shape index: {}]   ;;  %s2400_s4 = inlined_call_operand.hbm [shape: f32[32,128], index: 4, kind: input, shape index: {}]   ;;  %s2401_s5 = inlined_call_operand.hbm [shape: f32[32,128], index: 5, kind: input, shape index: {}]   ;;  %s2402_s6 = inlined_call_operand.vmem [shape: f32[1,128], index: 6, kind: input, shape index: {}]   ;;  %s2403_s7 = inlined_call_operand.vmem [shape: f32[2,2,32], index: 7, kind: input, shape index: {}]   ;;  %s2404_s8 = inlined_call_operand.vmem [shape: f32[2,2,32], index: 8, kind: input, shape index: {}]   ;;  %s2405_s9 = inlined_call_operand.hbm [shape: f32[32,96], index: 9, kind: input, shape index: {}]   ;;  %s2406_s10 = inlined_call_operand.vmem [shape: f32[1,96], index: 10, kind: input, shape index: {}]   ;;  %s2407_s11 = inlined_call_operand.hbm [shape: f32[32,32], index: 11, kind: input, shape index: {}]   ;;  %s2408_s12 = inlined_call_operand.vmem [shape: f32[1,32], index: 12, kind: input, shape index: {}]   ;;  %s2409_s13 = inlined_call_operand.vmem [shape: f32[32,4], index: 13, kind: input, shape index: {}]   ;;  %s2410_s14 = inlined_call_operand.vmem [shape: f32[1,4], index: 14, kind: input, shape index: {}]   ;;  %s2411_s15 = inlined_call_operand.hbm [shape: f32[2,4], index: 15, kind: output, shape index: {}]  }
   0x1   :  { %21 = vsyncpa [#allocation6], 0 }
   0x2   :  { %22 = vsyncpa [#allocation9], 0 }
   0x3   :  { %23 = vsyncpa [#allocation4], 0  ;;  %s49_s20 = sshll.u32 %s2401_s5, 4  ;;  %s1923_s21 = smov [#allocation5]   ;;  %s50_s20 = int_to_ptr.hbm [resolvable:$true] %s49_s20 }
   0x4   :  { %s51_s22 = sshll.u32 %s1923_s21, 4  ;;  %s36_s25 = sshll.u32 %s2400_s4, 4  ;;  %s52_s22 = int_to_ptr.vmem [resolvable:$true] %s51_s22  ;;  %s37_s25 = int_to_ptr.hbm [resolvable:$true] %s36_s25 }
   0x5   :  { %s1924_s26 = smov 128   ;;  %s1925_s27 = smov 8  }
   0x6   :  { %57 = dma.hbm_to_vmem [thread:$0]  %s50_s20, 512, %s52_s22, [#allocation6], %s1924_s26, %s1924_s26, %s1925_s27  }
   0x7   :  { %s1926_s28 = smov [#allocation2]   ;;  %s68_s17 = sshll.u32 %s2405_s9, 4  ;;  %s69_s17 = int_to_ptr.hbm [resolvable:$true] %s68_s17 }
   0x8   :  { %s38_s29 = sshll.u32 %s1926_s28, 4  ;;  %s83_s19 = sshll.u32 %s2407_s11, 4  ;;  %s39_s29 = int_to_ptr.vmem [resolvable:$true] %s38_s29  ;;  %s84_s19 = int_to_ptr.hbm [resolvable:$true] %s83_s19 }
   0x9   :  { %44 = dma.hbm_to_vmem [thread:$0]  %s37_s25, 512, %s39_s29, [#allocation3], %s1924_s26, %s1924_s26, %s1925_s27  }
   0xa   :  { %s1927_s21 = smov [#allocation7]   ;;  %s1928_s4 = smov [#allocation8]  }
   0xb   :  { %s70_s23 = sshll.u32 %s1927_s21, 4  ;;  %s85_s20 = sshll.u32 %s1928_s4, 4  ;;  %s71_s23 = int_to_ptr.vmem [resolvable:$true] %s70_s23  ;;  %s86_s20 = int_to_ptr.vmem [resolvable:$true] %s85_s20 }
   0xc   :  { %76 = dma.hbm_to_vmem [thread:$0]  %s69_s17, 512, %s71_s23, [#allocation6], %s1924_s26, %s1924_s26, %s1925_s27  }
   0xd   :  { %91 = dma.hbm_to_vmem [thread:$0]  %s84_s19, 512, %s86_s20, [#allocation9], %s1924_s26, %s1924_s26, %s1925_s27  }
   0xe   :  { %1915 = dma.done.wait [#allocation3], 512  }
   0xf   :  { %1916 = vsyncadd [#allocation3], 4294966784 }
  0x10   :  { %1917 = dma.done.wait [#allocation6], 1024  }
  0x11   :  { %1918 = vsyncadd [#allocation6], 4294966272 }
  0x12   :  { %1919 = dma.done.wait [#allocation9], 512  }
  0x13   :  { %1920 = vsyncadd [#allocation9], 4294966784  ;;  %vm121_vm0 = vcmask 64512   ;;  %v2028_v0 = vld [vmem:[%s2398_s2 + $0x18] sm:$0xff]  ;;  %v2033_v1 = vld [vmem:[%s2398_s2 + $0x10] sm:$0xff]  ;;  %vm161_vm1 = vcmask 261120  }
  0x14   :  { %v114_v2 = vld [vmem:[%s2397_s1] sm:$0xff]  ;;  %177 = vmatpush.msra.mxu1 %v2028_v0  ;;  %v2045_v4 = vld [vmem:[%s2398_s2 + $0x8] sm:$0xff]  ;;  %244 = vmatpush.msra.mxu2 %v2028_v0  ;;  %s1929_s19 = smov 32   ;;  %v2087_v34 = vld [vmem:[#allocation2 + $0x18] sm:$0xff]  ;;  %s1931_s26 = smov 96  }
  0x15   :  { %143 = vmatpush.msra.mxu0 %v114_v2  ;;  %v116_v3 = vld [vmem:[%s2396_s0] sm:$0xff]  ;;  %v2089_v35 = vld [vmem:[#allocation2 + $0x10] sm:$0xff]  ;;  %316 = vmatpush.msra.mxu3 %v2087_v34  ;;  %v2092_v36 = vld [vmem:[#allocation2 + $0x8] sm:$0xff]  ;;  %s1932_s23 = smov [#allocation10]   ;;  %s1584_s20 = sshll.u32 %s2411_s15, 4  ;;  %s1585_s20 = int_to_ptr.hbm [resolvable:$true] %s1584_s20 }
  0x16   :  { %1596 = vmatmul.msk.f32.vlgmr.msra.gmra.mxu0 %vm121_vm0, %v116_v3  ;;  %178 = vmatpush.msra.mxu1 %v2033_v1  ;;  %v2053_v5 = vld [vmem:[%s2398_s2] sm:$0xff]  ;;  %v2104_v40 = vld [vmem:[#allocation5 + $0x18] sm:$0xff]  ;;  %v2106_v41 = vld [vmem:[#allocation5 + $0x10] sm:$0xff] }
  0x17   :  { %245 = vmatpush.msra.mxu2 %v2033_v1  ;;  %v151_v6 = vld [vmem:[%s2403_s7] sm:$0x3]  ;;  %317 = vmatpush.msra.mxu3 %v2089_v35  ;;  %v2110_v42 = vld [vmem:[#allocation5 + $0x8] sm:$0xff]  ;;  %v1598_v44 = vld [vmem:[%s2403_s7 + $0x2] sm:$0x3] }
  0x18   :  { %179 = vmatpush.msra.mxu1 %v2045_v4  ;;  %v2071_v7 = vld [vmem:[%s2399_s3] ss:$0 sm:$0xff]  ;;  %s1930_s3 = smov 64   ;;  %500 = vmatpush.msrb.mxu0 %v2104_v40  ;;  %v1599_v56 = vld [vmem:[%s2404_s8 + $0x2] sm:$0x3] }
  0x19   :  { %246 = vmatpush.msra.mxu2 %v2045_v4  ;;  %v154_v13 = vld [vmem:[%s2404_s8] sm:$0x3]  ;;  %318 = vmatpush.msra.mxu3 %v2092_v36 }
  0x1a   :  { %180 = vmatpush.msra.mxu1 %v2053_v5  ;;  %v2095_v37 = vld [vmem:[#allocation2] sm:$0xff]  ;;  %501 = vmatpush.msrb.mxu0 %v2106_v41 }
  0x1b   :  { %1600 = vmatmul.msk.f32.vlgmr.msra.gmra.mxu1 %vm161_vm1, %v151_v6  ;;  %247 = vmatpush.msra.mxu2 %v2053_v5  ;;  %v2114_v43 = vld [vmem:[#allocation5] sm:$0xff] }
  0x1c   :  { %319 = vmatpush.msra.mxu3 %v2095_v37  ;;  %343 = vmatpush.msrb.mxu1 %v2104_v40  ;;  %v2149_v46 = vld [vmem:[%s2402_s6] ss:$0 sm:$0xff] }
  0x1d   :  { %411 = vmatpush.msrb.mxu2 %v2028_v0  ;;  %502 = vmatpush.msrb.mxu0 %v2110_v42 }
  0x1e   :  { %475 = vmatpush.msrb.mxu3 %v2087_v34  ;;  %344 = vmatpush.msrb.mxu1 %v2106_v41 }
  0x1f   :  { %412 = vmatpush.msrb.mxu2 %v2033_v1  ;;  %503 = vmatpush.msrb.mxu0 %v2114_v43 }
  0x20   :  { %476 = vmatpush.msrb.mxu3 %v2089_v35  ;;  %345 = vmatpush.msrb.mxu1 %v2110_v42 }
  0x21   :  { %413 = vmatpush.msrb.mxu2 %v2045_v4  ;;  %717 = vmatpush.msra.mxu0 %v2028_v0 }
  0x22   :  { %477 = vmatpush.msrb.mxu3 %v2092_v36  ;;  %346 = vmatpush.msrb.mxu1 %v2114_v43 }
  0x23   :  { %414 = vmatpush.msrb.mxu2 %v2053_v5  ;;  %1605 = vmatmul.msk.f32.vlgmr.msrb.gmra.mxu1 %vm161_vm1, %v1598_v44 }
  0x24   :  { %478 = vmatpush.msrb.mxu3 %v2095_v37  ;;  %564 = vmatpush.msra.mxu1 %v2028_v0 }
  0x25   :  { %718 = vmatpush.msra.mxu0 %v2033_v1 }
  0x26   :  { %565 = vmatpush.msra.mxu1 %v2033_v1 }
  0x27   :  { %719 = vmatpush.msra.mxu0 %v2045_v4 }
  0x28   :  { %566 = vmatpush.msra.mxu1 %v2045_v4 }
  0x29   :  { %720 = vmatpush.msra.mxu0 %v2053_v5 }
  0x2a   :  { %567 = vmatpush.msra.mxu1 %v2053_v5 }
  0x2c   :  { %778 = vmatpush.msrb.mxu1 %v2087_v34 }
  0x2e   :  { %779 = vmatpush.msrb.mxu1 %v2089_v35 }
  0x30   :  { %780 = vmatpush.msrb.mxu1 %v2092_v36 }
  0x32   :  { %781 = vmatpush.msrb.mxu1 %v2095_v37 }
  0x93   :  { %v145_v8 = vpop.f32.mrf.mxu0 }
  0x94   :  { %v2074_v9 = vadd.f32 %v2071_v7, %v145_v8 }
  0x98   :  { %v182_v10 = vpop.f32.mrf.mxu1 }
  0x99   :  { %v185_v11 = vadd.f32 %v182_v10, %v2074_v9 }
  0x9b   :  { %1662 = vtanh.f32 %v185_v11  ;;  %v1601_v14 = vmul.f32 -1.442695, %v185_v11 }
  0x9d   :  { %1664 = vpow2.f32 %v1601_v14 }
  0xa0   :  { %v348_v47 = vpop.f32.mrf.mxu1 }
  0xa1   :  { %v1663_v12 = vpop.eup %1662 }
  0xa2   :  { %212 = vrot.lane.b32.xlu0 %v1663_v12, %s1929_s19 }
  0xa3   :  { %v1665_v15 = vpop.eup %1664 }
  0xa4   :  { %v189_v16 = vadd.f32 1.0, %v1665_v15 }
  0xa6   :  { %1666 = vrcp.f32 %v189_v16  ;;  %v201_v22 = vand.u32 2147483648, %v189_v16  ;;  %vm195_vm3 = vweird.f32 %v189_v16  ;;  %v199_v23 = vand.u32 2147483647, %v189_v16 }
  0xa8   :  { %v202_v25 = vor.u32 1.1754944e-38, %v201_v22  ;;  %vm200_vm5 = vcmp.eq.f32.partialorder %v199_v23, 8.507059e+37 }
  0xaa   :  { %207 = vrot.lane.b32.xlu0 %v154_v13, %s1929_s19 }
  0xac   :  { %v1667_v17 = vpop.eup %1666 }
  0xad   :  { %v191_v18 = vmul.f32 %v1667_v17, %v189_v16  ;;  %vm196_vm2 = vweird.f32 %v1667_v17 }
  0xae   :  { %vm197_vm4 = vmor %vm195_vm3, %vm196_vm2 }
  0xaf   :  { %v192_v19 = vsub.f32 1.0, %v191_v18 }
  0xb1   :  { %v193_v20 = vmul.f32 %v1667_v17, %v192_v19 }
  0xb3   :  { %v194_v21 = vadd.f32 %v1667_v17, %v193_v20 }
  0xb5   :  { %v198_v24 = vsel %vm197_vm4, %v1667_v17, %v194_v21 }
  0xb6   :  { %v203_v27 = vsel %vm200_vm5, %v202_v25, %v198_v24 }
 0x114   :  { %v213_v26 = vpop.permute.xlu0 %212 }
 0x115   :  { %v215_v28 = vmul.f32 %v213_v26, %v203_v27 }
 0x117   :  { %217 = vrot.lane.b32.xlu1 %v215_v28, %s1929_s19 }
 0x11c   :  { %v208_v29 = vpop.permute.xlu0 %207 }
 0x11d   :  { %v210_v30 = vmul.f32 %v208_v29, %v203_v27 }
 0x189   :  { %v218_v31 = vpop.permute.xlu1 %217 }
 0x18a   :  { %v2083_v32 = vadd.f32 %v218_v31, %v210_v30 }
 0x18c   :  { %1668 = vtanh.f32 %v2083_v32  ;;  %v277_v29 = vrot.slane %v2083_v32, 6  ;;  %v117_v32 = vld [vmem:[%s2396_s0 + $0x8] sm:$0xff] }
 0x18d   :  { %1597 = vmatmul.msk.f32.gmra.mxu0 %vm121_vm0, %v117_v32 }
 0x192   :  { %v1669_v33 = vpop.eup %1668 }
 0x193   :  { %223 = vrot.lane.b32.xlu1 %v1669_v33, %s1929_s19 }
 0x205   :  { %v224_v38 = vpop.permute.xlu1 %223 }
 0x206   :  { %v226_v39 = vmul.f32 %v224_v38, %v203_v27 }
 0x208   :  { %228 = vrot.lane.b32.xlu2 %v226_v39, %s1930_s3 }
 0x262   :  { %v229_v45 = vpop.permute.xlu2 %228 }
 0x263   :  { %1602 = vmatmul.msk.f32.vlgmr.msra.gmra.mxu2 %vm161_vm1, %v229_v45  ;;  %1604 = vmatmul.msk.f32.vlgmr.msra.gmra.mxu3 %vm161_vm1, %v229_v45 }
 0x264   :  { %628 = vmatpush.msra.mxu2 %v2087_v34  ;;  %653 = vmatpush.msra.mxu3 %v2104_v40 }
 0x266   :  { %629 = vmatpush.msra.mxu2 %v2089_v35  ;;  %654 = vmatpush.msra.mxu3 %v2106_v41 }
 0x268   :  { %630 = vmatpush.msra.mxu2 %v2092_v36  ;;  %655 = vmatpush.msra.mxu3 %v2110_v42 }
 0x26a   :  { %631 = vmatpush.msra.mxu2 %v2095_v37  ;;  %656 = vmatpush.msra.mxu3 %v2114_v43 }
 0x2e6   :  { %v249_v48 = vpop.f32.mrf.mxu2  ;;  %v321_v49 = vpop.f32.mrf.mxu3 }
 0x2e7   :  { %v253_v50 = vrot.slane %v249_v48, 6  ;;  %v322_v51 = vadd.f32 %v2149_v46, %v321_v49 }
 0x2e9   :  { %v255_v52 = vadd.f32 %v253_v50, %v2074_v9  ;;  %v351_v53 = vadd.f32 %v348_v47, %v322_v51 }
 0x2eb   :  { %1670 = vtanh.f32 %v255_v52  ;;  %v1603_v57 = vmul.f32 -1.442695, %v255_v52  ;;  %v1606_v61 = vmul.f32 -1.442695, %v351_v53 }
 0x2ec   :  { %1672 = vtanh.f32 %v351_v53 }
 0x2ed   :  { %1674 = vpow2.f32 %v1603_v57 }
 0x2f1   :  { %v1671_v54 = vpop.eup %1670 }
 0x2f2   :  { %v1673_v55 = vpop.eup %1672  ;;  %281 = vrot.lane.b32.xlu2 %v1671_v54, %s1929_s19 }
 0x2f3   :  { %378 = vrot.lane.b32.xlu0 %v1673_v55, %s1929_s19  ;;  %v1675_v58 = vpop.eup %1674 }
 0x2f4   :  { %v259_v59 = vadd.f32 1.0, %v1675_v58 }
 0x2f6   :  { %1676 = vrcp.f32 %v259_v59  ;;  %v271_v10 = vand.u32 2147483648, %v259_v59  ;;  %vm265_vm7 = vweird.f32 %v259_v59  ;;  %v269_v11 = vand.u32 2147483647, %v259_v59 }
 0x2f7   :  { %1678 = vpow2.f32 %v1606_v61 }
 0x2f8   :  { %v272_v13 = vor.u32 1.1754944e-38, %v271_v10  ;;  %vm270_vm9 = vcmp.eq.f32.partialorder %v269_v11, 8.507059e+37 }
 0x2fa   :  { %373 = vrot.lane.b32.xlu2 %v1599_v56, %s1929_s19  ;;  %v2191_v56 = vpop.f32.mrf.mxu0 }
 0x2fc   :  { %v1677_v60 = vpop.eup %1676 }
 0x2fd   :  { %v261_v62 = vmul.f32 %v1677_v60, %v259_v59  ;;  %v1679_v3 = vpop.eup %1678  ;;  %vm266_vm6 = vweird.f32 %v1677_v60 }
 0x2fe   :  { %v355_v6 = vadd.f32 1.0, %v1679_v3  ;;  %vm267_vm8 = vmor %vm265_vm7, %vm266_vm6 }
 0x2ff   :  { %v262_v63 = vsub.f32 1.0, %v261_v62 }
 0x300   :  { %1680 = vrcp.f32 %v355_v6  ;;  %v367_v22 = vand.u32 2147483648, %v355_v6  ;;  %vm361_vm11 = vweird.f32 %v355_v6  ;;  %v365_v23 = vand.u32 2147483647, %v355_v6 }
 0x301   :  { %v263_v2 = vmul.f32 %v1677_v60, %v262_v63 }
 0x302   :  { %v368_v25 = vor.u32 1.1754944e-38, %v367_v22  ;;  %vm366_vm13 = vcmp.eq.f32.partialorder %v365_v23, 8.507059e+37 }
 0x303   :  { %v264_v8 = vadd.f32 %v1677_v60, %v263_v2 }
 0x305   :  { %v268_v12 = vsel %vm267_vm8, %v1677_v60, %v264_v8 }
 0x306   :  { %v273_v15 = vsel %vm270_vm9, %v272_v13, %v268_v12  ;;  %v1681_v17 = vpop.eup %1680 }
 0x307   :  { %v357_v18 = vmul.f32 %v1681_v17, %v355_v6  ;;  %vm362_vm10 = vweird.f32 %v1681_v17  ;;  %v279_v30 = vmul.f32 %v277_v29, %v273_v15 }
 0x308   :  { %vm363_vm12 = vmor %vm361_vm11, %vm362_vm10 }
 0x309   :  { %v358_v19 = vsub.f32 1.0, %v357_v18 }
 0x30b   :  { %v359_v20 = vmul.f32 %v1681_v17, %v358_v19 }
 0x30d   :  { %v360_v21 = vadd.f32 %v1681_v17, %v359_v20 }
 0x30f   :  { %v364_v24 = vsel %vm363_vm12, %v1681_v17, %v360_v21 }
 0x310   :  { %v369_v26 = vsel %vm366_vm13, %v368_v25, %v364_v24 }
 0x34c   :  { %v282_v14 = vpop.permute.xlu2 %281 }
 0x34d   :  { %v284_v16 = vmul.f32 %v282_v14, %v273_v15 }
 0x34f   :  { %286 = vrot.lane.b32.xlu1 %v284_v16, %s1929_s19 }
 0x354   :  { %v374_v39 = vpop.permute.xlu2 %373 }
 0x355   :  { %v376_v44 = vmul.f32 %v374_v39, %v369_v26 }
 0x365   :  { %v379_v27 = vpop.permute.xlu0 %378 }
 0x366   :  { %v381_v28 = vmul.f32 %v379_v27, %v369_v26 }
 0x368   :  { %383 = vrot.lane.b32.xlu0 %v381_v28, %s1929_s19 }
 0x3c1   :  { %v287_v31 = vpop.permute.xlu1 %286 }
 0x3c2   :  { %v2162_v33 = vadd.f32 %v287_v31, %v279_v30 }
 0x3c4   :  { %1682 = vtanh.f32 %v2162_v33 }
 0x3ca   :  { %v1683_v38 = vpop.eup %1682 }
 0x3cb   :  { %292 = vrot.lane.b32.xlu1 %v1683_v38, %s1929_s19 }
 0x3da   :  { %v384_v45 = vpop.permute.xlu0 %383 }
 0x3db   :  { %v2166_v47 = vadd.f32 %v384_v45, %v376_v44 }
 0x3dd   :  { %1684 = vtanh.f32 %v2166_v47 }
 0x3e3   :  { %v1685_v48 = vpop.eup %1684 }
 0x3e4   :  { %389 = vrot.lane.b32.xlu2 %v1685_v48, %s1929_s19 }
 0x43d   :  { %v293_v49 = vpop.permute.xlu1 %292 }
 0x43e   :  { %v390_v50 = vpop.permute.xlu2 %389  ;;  %v295_v51 = vmul.f32 %v293_v49, %v273_v15  ;;  %v444_v49 = vrot.slane %v2162_v33, 6 }
 0x43f   :  { %v392_v52 = vmul.f32 %v390_v50, %v369_v26 }
 0x440   :  { %v394_v53 = vrot.slane %v295_v51, 2 }
 0x441   :  { %484 = vrot.lane.b32.xlu1 %v392_v52, %s1930_s3 }
 0x442   :  { %395 = vrot.lane.b32.xlu0 %v394_v53, %s1930_s3 }
 0x4b3   :  { %v485_v54 = vpop.permute.xlu1 %484 }
 0x4b4   :  { %1610 = vmatmul.msk.f32.vlgmr.msrb.gmra.mxu0 %vm161_vm1, %v485_v54  ;;  %v396_v55 = vpop.permute.xlu0 %395 }
 0x4b5   :  { %1607 = vmatmul.msk.f32.vlgmr.msrb.gmra.mxu2 %vm161_vm1, %v396_v55  ;;  %1609 = vmatmul.msk.f32.vlgmr.msrb.gmra.mxu3 %vm161_vm1, %v396_v55 }
 0x4b6   :  { %803 = vmatpush.msrb.mxu2 %v2104_v40  ;;  %866 = vmatpush.msrb.mxu3 %v2028_v0 }
 0x4b7   :  { %930 = vmatpush.msrb.mxu0 %v2087_v34 }
 0x4b8   :  { %804 = vmatpush.msrb.mxu2 %v2106_v41  ;;  %867 = vmatpush.msrb.mxu3 %v2033_v1 }
 0x4b9   :  { %931 = vmatpush.msrb.mxu0 %v2089_v35 }
 0x4ba   :  { %805 = vmatpush.msrb.mxu2 %v2110_v42  ;;  %868 = vmatpush.msrb.mxu3 %v2045_v4 }
 0x4bb   :  { %932 = vmatpush.msrb.mxu0 %v2092_v36 }
 0x4bc   :  { %806 = vmatpush.msrb.mxu2 %v2114_v43  ;;  %869 = vmatpush.msrb.mxu3 %v2053_v5 }
 0x4bd   :  { %933 = vmatpush.msrb.mxu0 %v2095_v37 }
 0x531   :  { %v505_v61 = vpop.f32.mrf.mxu0 }
 0x538   :  { %v416_v57 = vpop.f32.mrf.mxu2  ;;  %v480_v58 = vpop.f32.mrf.mxu3 }
 0x539   :  { %v420_v59 = vrot.slane %v416_v57, 4  ;;  %v481_v60 = vadd.f32 %v2149_v46, %v480_v58 }
 0x53b   :  { %v422_v62 = vadd.f32 %v420_v59, %v2074_v9  ;;  %v508_v63 = vadd.f32 %v505_v61, %v481_v60 }
 0x53d   :  { %1686 = vtanh.f32 %v422_v62  ;;  %v1608_v6 = vmul.f32 -1.442695, %v422_v62  ;;  %v1611_v12 = vmul.f32 -1.442695, %v508_v63 }
 0x53e   :  { %1688 = vtanh.f32 %v508_v63 }
 0x53f   :  { %1690 = vpow2.f32 %v1608_v6 }
 0x543   :  { %v1687_v2 = vpop.eup %1686 }
 0x544   :  { %v1689_v3 = vpop.eup %1688  ;;  %448 = vrot.lane.b32.xlu2 %v1687_v2, %s1929_s19 }
 0x545   :  { %531 = vrot.lane.b32.xlu0 %v1689_v3, %s1929_s19  ;;  %v1691_v8 = vpop.eup %1690 }
 0x546   :  { %v426_v10 = vadd.f32 1.0, %v1691_v8 }
 0x548   :  { %1692 = vrcp.f32 %v426_v10  ;;  %v438_v19 = vand.u32 2147483648, %v426_v10  ;;  %vm432_vm15 = vweird.f32 %v426_v10  ;;  %v436_v20 = vand.u32 2147483647, %v426_v10 }
 0x549   :  { %1694 = vpow2.f32 %v1611_v12 }
 0x54a   :  { %v439_v22 = vor.u32 1.1754944e-38, %v438_v19  ;;  %vm437_vm2 = vcmp.eq.f32.partialorder %v436_v20, 8.507059e+37 }
 0x54e   :  { %v1693_v11 = vpop.eup %1692 }
 0x54f   :  { %v428_v13 = vmul.f32 %v1693_v11, %v426_v10  ;;  %v1695_v16 = vpop.eup %1694  ;;  %vm433_vm14 = vweird.f32 %v1693_v11 }
 0x550   :  { %v512_v17 = vadd.f32 1.0, %v1695_v16  ;;  %vm434_vm0 = vmor %vm432_vm15, %vm433_vm14 }
 0x551   :  { %v429_v14 = vsub.f32 1.0, %v428_v13 }
 0x552   :  { %1696 = vrcp.f32 %v512_v17  ;;  %v524_v31 = vand.u32 2147483648, %v512_v17  ;;  %vm518_vm4 = vweird.f32 %v512_v17  ;;  %v522_v38 = vand.u32 2147483647, %v512_v17 }
 0x553   :  { %v430_v15 = vmul.f32 %v1693_v11, %v429_v14 }
 0x554   :  { %v525_v44 = vor.u32 1.1754944e-38, %v524_v31  ;;  %vm523_vm6 = vcmp.eq.f32.partialorder %v522_v38, 8.507059e+37 }
 0x555   :  { %v431_v18 = vadd.f32 %v1693_v11, %v430_v15 }
 0x557   :  { %v435_v21 = vsel %vm434_vm0, %v1693_v11, %v431_v18 }
 0x558   :  { %v440_v24 = vsel %vm437_vm2, %v439_v22, %v435_v21  ;;  %v1697_v26 = vpop.eup %1696 }
 0x559   :  { %v514_v27 = vmul.f32 %v1697_v26, %v512_v17  ;;  %vm519_vm3 = vweird.f32 %v1697_v26  ;;  %v446_v50 = vmul.f32 %v444_v49, %v440_v24 }
 0x55a   :  { %vm520_vm5 = vmor %vm518_vm4, %vm519_vm3 }
 0x55b   :  { %v515_v28 = vsub.f32 1.0, %v514_v27 }
 0x55d   :  { %v516_v29 = vmul.f32 %v1697_v26, %v515_v28 }
 0x55f   :  { %v517_v30 = vadd.f32 %v1697_v26, %v516_v29 }
 0x561   :  { %v521_v39 = vsel %vm520_vm5, %v1697_v26, %v517_v30 }
 0x562   :  { %v526_v48 = vsel %vm523_vm6, %v525_v44, %v521_v39 }
 0x563   :  { %v529_v51 = vmul.f32 %v526_v48, %v2166_v47 }
 0x59e   :  { %v449_v23 = vpop.permute.xlu2 %448 }
 0x59f   :  { %v451_v25 = vmul.f32 %v449_v23, %v440_v24 }
 0x5a1   :  { %453 = vrot.lane.b32.xlu1 %v451_v25, %s1929_s19 }
 0x5b7   :  { %v532_v45 = vpop.permute.xlu0 %531 }
 0x5b8   :  { %v534_v32 = vmul.f32 %v532_v45, %v526_v48 }
 0x5ba   :  { %536 = vrot.lane.b32.xlu2 %v534_v32, %s1929_s19 }
 0x613   :  { %v454_v52 = vpop.permute.xlu1 %453 }
 0x614   :  { %v537_v53 = vpop.permute.xlu2 %536  ;;  %v2201_v54 = vadd.f32 %v454_v52, %v446_v50 }
 0x615   :  { %v2203_v55 = vadd.f32 %v537_v53, %v529_v51 }
 0x616   :  { %1698 = vtanh.f32 %v2201_v54 }
 0x617   :  { %1700 = vtanh.f32 %v2203_v55 }
 0x61c   :  { %v1699_v57 = vpop.eup %1698 }
 0x61d   :  { %v1701_v58 = vpop.eup %1700  ;;  %459 = vrot.lane.b32.xlu0 %v1699_v57, %s1929_s19 }
 0x61e   :  { %542 = vrot.lane.b32.xlu1 %v1701_v58, %s1929_s19  ;;  %v597_v58 = vrot.slane %v2201_v54, 6 }
 0x68f   :  { %v460_v33 = vpop.permute.xlu0 %459 }
 0x690   :  { %v462_v59 = vmul.f32 %v460_v33, %v440_v24  ;;  %v543_v60 = vpop.permute.xlu1 %542 }
 0x691   :  { %v545_v47 = vmul.f32 %v543_v60, %v526_v48 }
 0x692   :  { %v547_v61 = vrot.slane %v462_v59, 4 }
 0x693   :  { %637 = vrot.lane.b32.xlu0 %v545_v47, %s1930_s3 }
 0x694   :  { %548 = vrot.lane.b32.xlu2 %v547_v61, %s1930_s3 }
 0x6ee   :  { %v549_v62 = vpop.permute.xlu2 %548 }
 0x6ef   :  { %1612 = vmatmul.msk.f32.vlgmr.msra.gmra.mxu1 %vm161_vm1, %v549_v62  ;;  %1614 = vmatmul.msk.f32.vlgmr.msra.gmra.mxu2 %vm161_vm1, %v549_v62 }
 0x6f0   :  { %955 = vmatpush.msra.mxu1 %v2104_v40  ;;  %1019 = vmatpush.msra.mxu2 %v2028_v0 }
 0x6f2   :  { %956 = vmatpush.msra.mxu1 %v2106_v41  ;;  %1020 = vmatpush.msra.mxu2 %v2033_v1 }
 0x6f4   :  { %957 = vmatpush.msra.mxu1 %v2110_v42  ;;  %1021 = vmatpush.msra.mxu2 %v2045_v4 }
 0x6f6   :  { %958 = vmatpush.msra.mxu1 %v2114_v43  ;;  %1022 = vmatpush.msra.mxu2 %v2053_v5 }
 0x705   :  { %v638_v63 = vpop.permute.xlu0 %637 }
 0x706   :  { %1615 = vmatmul.msk.f32.vlgmr.msra.gmra.mxu3 %vm161_vm1, %v638_v63 }
 0x707   :  { %1083 = vmatpush.msra.mxu3 %v2087_v34 }
 0x709   :  { %1084 = vmatpush.msra.mxu3 %v2089_v35 }
 0x70b   :  { %1085 = vmatpush.msra.mxu3 %v2092_v36 }
 0x70d   :  { %1086 = vmatpush.msra.mxu3 %v2095_v37 }
 0x76c   :  { %v569_v2 = vpop.f32.mrf.mxu1 }
 0x76d   :  { %v573_v3 = vrot.slane %v569_v2, 2 }
 0x76f   :  { %v575_v6 = vadd.f32 %v573_v3, %v2074_v9 }
 0x771   :  { %1702 = vtanh.f32 %v575_v6  ;;  %v1613_v15 = vmul.f32 -1.442695, %v575_v6 }
 0x772   :  { %v633_v10 = vpop.f32.mrf.mxu2 }
 0x773   :  { %v634_v11 = vadd.f32 %v2149_v46, %v633_v10 }
 0x777   :  { %v1703_v8 = vpop.eup %1702 }
 0x778   :  { %601 = vrot.lane.b32.xlu1 %v1703_v8, %s1929_s19 }
 0x789   :  { %v658_v12 = vpop.f32.mrf.mxu3 }
 0x78a   :  { %v661_v13 = vadd.f32 %v658_v12, %v634_v11 }
 0x78c   :  { %1704 = vtanh.f32 %v661_v13  ;;  %v1616_v16 = vmul.f32 -1.442695, %v661_v13 }
 0x78d   :  { %1706 = vpow2.f32 %v1613_v15 }
 0x78e   :  { %1708 = vpow2.f32 %v1616_v16 }
 0x792   :  { %v1705_v14 = vpop.eup %1704 }
 0x793   :  { %684 = vrot.lane.b32.xlu2 %v1705_v14, %s1929_s19  ;;  %v1707_v17 = vpop.eup %1706 }
 0x794   :  { %v1709_v18 = vpop.eup %1708  ;;  %v579_v9 = vadd.f32 1.0, %v1707_v17 }
 0x795   :  { %v665_v19 = vadd.f32 1.0, %v1709_v18 }
 0x796   :  { %1710 = vrcp.f32 %v579_v9  ;;  %v591_v29 = vand.u32 2147483648, %v579_v9  ;;  %vm585_vm8 = vweird.f32 %v579_v9  ;;  %v589_v30 = vand.u32 2147483647, %v579_v9 }
 0x797   :  { %1712 = vrcp.f32 %v665_v19  ;;  %v677_v39 = vand.u32 2147483648, %v665_v19  ;;  %vm671_vm11 = vweird.f32 %v665_v19  ;;  %v675_v45 = vand.u32 2147483647, %v665_v19 }
 0x798   :  { %v592_v44 = vor.u32 1.1754944e-38, %v591_v29  ;;  %vm590_vm12 = vcmp.eq.f32.partialorder %v589_v30, 8.507059e+37 }
 0x799   :  { %v678_v51 = vor.u32 1.1754944e-38, %v677_v39  ;;  %vm676_vm14 = vcmp.eq.f32.partialorder %v675_v45, 8.507059e+37 }
 0x79c   :  { %v1711_v20 = vpop.eup %1710 }
 0x79d   :  { %v1713_v21 = vpop.eup %1712  ;;  %v581_v22 = vmul.f32 %v1711_v20, %v579_v9  ;;  %vm586_vm7 = vweird.f32 %v1711_v20 }
 0x79e   :  { %v667_v23 = vmul.f32 %v1713_v21, %v665_v19  ;;  %vm587_vm9 = vmor %vm585_vm8, %vm586_vm7  ;;  %vm672_vm10 = vweird.f32 %v1713_v21 }
 0x79f   :  { %v582_v24 = vsub.f32 1.0, %v581_v22  ;;  %vm673_vm13 = vmor %vm671_vm11, %vm672_vm10 }
 0x7a0   :  { %v668_v25 = vsub.f32 1.0, %v667_v23 }
 0x7a1   :  { %v583_v26 = vmul.f32 %v1711_v20, %v582_v24 }
 0x7a2   :  { %v669_v27 = vmul.f32 %v1713_v21, %v668_v25 }
 0x7a3   :  { %v584_v28 = vadd.f32 %v1711_v20, %v583_v26 }
 0x7a4   :  { %v670_v31 = vadd.f32 %v1713_v21, %v669_v27 }
 0x7a5   :  { %v588_v38 = vsel %vm587_vm9, %v1711_v20, %v584_v28 }
 0x7a6   :  { %v593_v48 = vsel %vm590_vm12, %v592_v44, %v588_v38  ;;  %v674_v49 = vsel %vm673_vm13, %v1713_v21, %v670_v31 }
 0x7a7   :  { %v679_v53 = vsel %vm676_vm14, %v678_v51, %v674_v49  ;;  %v599_v33 = vmul.f32 %v597_v58, %v593_v48 }
 0x7a8   :  { %v682_v47 = vmul.f32 %v679_v53, %v2203_v55 }
 0x7ea   :  { %v602_v32 = vpop.permute.xlu1 %601 }
 0x7eb   :  { %v604_v50 = vmul.f32 %v602_v32, %v593_v48 }
 0x7ed   :  { %v685_v52 = vpop.permute.xlu2 %684  ;;  %606 = vrot.lane.b32.xlu0 %v604_v50, %s1929_s19 }
 0x7ee   :  { %v687_v57 = vmul.f32 %v685_v52, %v679_v53 }
 0x7f0   :  { %689 = vrot.lane.b32.xlu1 %v687_v57, %s1929_s19 }
 0x85f   :  { %v607_v59 = vpop.permute.xlu0 %606 }
 0x860   :  { %v2233_v60 = vadd.f32 %v607_v59, %v599_v33 }
 0x862   :  { %1714 = vtanh.f32 %v2233_v60  ;;  %v690_v61 = vpop.permute.xlu1 %689  ;;  %v747_v58 = vrot.slane %v2233_v60, 6 }
 0x863   :  { %v2237_v62 = vadd.f32 %v690_v61, %v682_v47 }
 0x865   :  { %1716 = vtanh.f32 %v2237_v62 }
 0x868   :  { %v1715_v63 = vpop.eup %1714 }
 0x869   :  { %612 = vrot.lane.b32.xlu2 %v1715_v63, %s1929_s19 }
 0x86b   :  { %v1717_v2 = vpop.eup %1716 }
 0x86c   :  { %695 = vrot.lane.b32.xlu0 %v1717_v2, %s1929_s19 }
 0x8c3   :  { %v613_v54 = vpop.permute.xlu2 %612 }
 0x8c4   :  { %v615_v3 = vmul.f32 %v613_v54, %v593_v48 }
 0x8c6   :  { %v700_v6 = vrot.slane %v615_v3, 6 }
 0x8c8   :  { %701 = vrot.lane.b32.xlu1 %v700_v6, %s1930_s3 }
 0x8de   :  { %v696_v8 = vpop.permute.xlu0 %695 }
 0x8df   :  { %v698_v55 = vmul.f32 %v696_v8, %v679_v53 }
 0x8e1   :  { %787 = vrot.lane.b32.xlu2 %v698_v55, %s1930_s3 }
 0x93a   :  { %v702_v10 = vpop.permute.xlu1 %701 }
 0x93b   :  { %v788_v11 = vpop.permute.xlu2 %787  ;;  %1617 = vmatmul.msk.f32.vlgmr.msra.gmra.mxu0 %vm161_vm1, %v702_v10  ;;  %1619 = vmatmul.msk.f32.vlgmr.msrb.gmra.mxu1 %vm161_vm1, %v702_v10 }
 0x93c   :  { %1620 = vmatmul.msk.f32.vlgmr.msrb.gmra.mxu2 %vm161_vm1, %v788_v11  ;;  %1108 = vmatpush.msra.mxu0 %v2104_v40 }
 0x93d   :  { %1172 = vmatpush.msrb.mxu1 %v2028_v0  ;;  %1236 = vmatpush.msrb.mxu2 %v2087_v34  ;;  %v2261_v0 = vadd.f32 %v2071_v7, %v2191_v56 }
 0x93e   :  { %1109 = vmatpush.msra.mxu0 %v2106_v41 }
 0x93f   :  { %1173 = vmatpush.msrb.mxu1 %v2033_v1  ;;  %1237 = vmatpush.msrb.mxu2 %v2089_v35 }
 0x940   :  { %1110 = vmatpush.msra.mxu0 %v2110_v42 }
 0x941   :  { %1174 = vmatpush.msrb.mxu1 %v2045_v4  ;;  %1238 = vmatpush.msrb.mxu2 %v2092_v36 }
 0x942   :  { %1111 = vmatpush.msra.mxu0 %v2114_v43 }
 0x943   :  { %1175 = vmatpush.msrb.mxu1 %v2053_v5  ;;  %1239 = vmatpush.msrb.mxu2 %v2095_v37 }
 0x9b8   :  { %v722_v12 = vpop.f32.mrf.mxu0  ;;  %v783_v13 = vpop.f32.mrf.mxu1 }
 0x9b9   :  { %v725_v1 = vadd.f32 %v722_v12, %v2261_v0  ;;  %v784_v14 = vadd.f32 %v2149_v46, %v783_v13 }
 0x9bb   :  { %1718 = vtanh.f32 %v725_v1  ;;  %v1618_v17 = vmul.f32 -1.442695, %v725_v1 }
 0x9bf   :  { %v808_v4 = vpop.f32.mrf.mxu2 }
 0x9c0   :  { %v811_v15 = vadd.f32 %v808_v4, %v784_v14 }
 0x9c1   :  { %v1719_v16 = vpop.eup %1718 }
 0x9c2   :  { %1720 = vtanh.f32 %v811_v15  ;;  %751 = vrot.lane.b32.xlu0 %v1719_v16, %s1929_s19  ;;  %v1621_v7 = vmul.f32 -1.442695, %v811_v15 }
 0x9c3   :  { %1722 = vpow2.f32 %v1618_v17 }
 0x9c4   :  { %1724 = vpow2.f32 %v1621_v7 }
 0x9c8   :  { %v1721_v5 = vpop.eup %1720 }
 0x9c9   :  { %834 = vrot.lane.b32.xlu1 %v1721_v5, %s1929_s19  ;;  %v1723_v56 = vpop.eup %1722 }
 0x9ca   :  { %v729_v18 = vadd.f32 1.0, %v1723_v56  ;;  %v1725_v9 = vpop.eup %1724 }
 0x9cb   :  { %v815_v19 = vadd.f32 1.0, %v1725_v9 }
 0x9cc   :  { %1726 = vrcp.f32 %v729_v18  ;;  %v741_v28 = vand.u32 2147483648, %v729_v18  ;;  %vm735_vm0 = vweird.f32 %v729_v18  ;;  %v739_v29 = vand.u32 2147483647, %v729_v18 }
 0x9cd   :  { %1728 = vrcp.f32 %v815_v19  ;;  %v827_v32 = vand.u32 2147483648, %v815_v19  ;;  %vm821_vm5 = vweird.f32 %v815_v19  ;;  %v825_v49 = vand.u32 2147483647, %v815_v19 }
 0x9ce   :  { %v742_v38 = vor.u32 1.1754944e-38, %v741_v28  ;;  %vm740_vm3 = vcmp.eq.f32.partialorder %v739_v29, 8.507059e+37 }
 0x9cf   :  { %v828_v51 = vor.u32 1.1754944e-38, %v827_v32  ;;  %vm826_vm7 = vcmp.eq.f32.partialorder %v825_v49, 8.507059e+37 }
 0x9d2   :  { %v1727_v20 = vpop.eup %1726 }
 0x9d3   :  { %v731_v21 = vmul.f32 %v1727_v20, %v729_v18  ;;  %v1729_v22 = vpop.eup %1728  ;;  %vm736_vm15 = vweird.f32 %v1727_v20 }
 0x9d4   :  { %v817_v24 = vmul.f32 %v1729_v22, %v815_v19  ;;  %vm737_vm2 = vmor %vm735_vm0, %vm736_vm15  ;;  %vm822_vm4 = vweird.f32 %v1729_v22 }
 0x9d5   :  { %v732_v23 = vsub.f32 1.0, %v731_v21  ;;  %vm823_vm6 = vmor %vm821_vm5, %vm822_vm4 }
 0x9d6   :  { %v818_v26 = vsub.f32 1.0, %v817_v24 }
 0x9d7   :  { %v733_v25 = vmul.f32 %v1727_v20, %v732_v23 }
 0x9d8   :  { %v819_v30 = vmul.f32 %v1729_v22, %v818_v26 }
 0x9d9   :  { %v734_v27 = vadd.f32 %v1727_v20, %v733_v25 }
 0x9da   :  { %v820_v45 = vadd.f32 %v1729_v22, %v819_v30 }
 0x9db   :  { %v738_v31 = vsel %vm737_vm2, %v1727_v20, %v734_v27 }
 0x9dc   :  { %v743_v44 = vsel %vm740_vm3, %v742_v38, %v738_v31  ;;  %v824_v50 = vsel %vm823_vm6, %v1729_v22, %v820_v45 }
 0x9dd   :  { %v829_v53 = vsel %vm826_vm7, %v828_v51, %v824_v50  ;;  %v749_v33 = vmul.f32 %v747_v58, %v743_v44 }
 0x9de   :  { %v832_v63 = vmul.f32 %v829_v53, %v2237_v62 }
 0xa34   :  { %v752_v39 = vpop.permute.xlu0 %751 }
 0xa35   :  { %v754_v48 = vmul.f32 %v752_v39, %v743_v44 }
 0xa37   :  { %756 = vrot.lane.b32.xlu2 %v754_v48, %s1929_s19 }
 0xa3b   :  { %v835_v52 = vpop.permute.xlu1 %834 }
 0xa3c   :  { %v837_v57 = vmul.f32 %v835_v52, %v829_v53 }
 0xa3e   :  { %839 = vrot.lane.b32.xlu0 %v837_v57, %s1929_s19 }
 0xa91   :  { %v757_v59 = vpop.permute.xlu2 %756 }
 0xa92   :  { %v2270_v47 = vadd.f32 %v757_v59, %v749_v33 }
 0xa94   :  { %1730 = vtanh.f32 %v2270_v47  ;;  %v899_v48 = vrot.slane %v2270_v47, 6 }
 0xa9a   :  { %v1731_v61 = vpop.eup %1730 }
 0xa9b   :  { %762 = vrot.lane.b32.xlu1 %v1731_v61, %s1929_s19 }
 0xab0   :  { %v840_v2 = vpop.permute.xlu0 %839 }
 0xab1   :  { %v2275_v54 = vadd.f32 %v840_v2, %v832_v63 }
 0xab3   :  { %1732 = vtanh.f32 %v2275_v54 }
 0xab9   :  { %v1733_v3 = vpop.eup %1732 }
 0xaba   :  { %845 = vrot.lane.b32.xlu2 %v1733_v3, %s1929_s19 }
 0xb0d   :  { %v763_v60 = vpop.permute.xlu1 %762 }
 0xb0e   :  { %v765_v6 = vmul.f32 %v763_v60, %v743_v44 }
 0xb10   :  { %850 = vrot.lane.b32.xlu0 %v765_v6, %s1930_s3 }
 0xb14   :  { %v846_v8 = vpop.permute.xlu2 %845 }
 0xb15   :  { %v848_v55 = vmul.f32 %v846_v8, %v829_v53 }
 0xb17   :  { %939 = vrot.lane.b32.xlu1 %v848_v55, %s1930_s3 }
 0xb82   :  { %v851_v10 = vpop.permute.xlu0 %850 }
 0xb83   :  { %1622 = vmatmul.msk.f32.vlgmr.msrb.gmra.mxu3 %vm161_vm1, %v851_v10  ;;  %1624 = vmatmul.msk.f32.vlgmr.msrb.gmra.mxu0 %vm161_vm1, %v851_v10 }
 0xb84   :  { %1261 = vmatpush.msrb.mxu3 %v2104_v40  ;;  %1325 = vmatpush.msrb.mxu0 %v2087_v34 }
 0xb86   :  { %1262 = vmatpush.msrb.mxu3 %v2106_v41  ;;  %1326 = vmatpush.msrb.mxu0 %v2089_v35 }
 0xb88   :  { %1263 = vmatpush.msrb.mxu3 %v2110_v42  ;;  %1327 = vmatpush.msrb.mxu0 %v2092_v36 }
 0xb89   :  { %v940_v62 = vpop.permute.xlu1 %939 }
 0xb8a   :  { %1625 = vmatmul.msk.f32.vlgmr.msra.gmra.mxu1 %vm161_vm1, %v940_v62  ;;  %1264 = vmatpush.msrb.mxu3 %v2114_v43 }
 0xb8b   :  { %1350 = vmatpush.msra.mxu1 %v2104_v40  ;;  %1328 = vmatpush.msrb.mxu0 %v2095_v37 }
 0xb8d   :  { %1351 = vmatpush.msra.mxu1 %v2106_v41 }
 0xb8f   :  { %1352 = vmatpush.msra.mxu1 %v2110_v42 }
 0xb91   :  { %1353 = vmatpush.msra.mxu1 %v2114_v43 }
 0xc00   :  { %v935_v34 = vpop.f32.mrf.mxu0 }
 0xc01   :  { %v936_v35 = vadd.f32 %v2149_v46, %v935_v34 }
 0xc06   :  { %v871_v11 = vpop.f32.mrf.mxu3 }
 0xc07   :  { %v875_v36 = vrot.slane %v871_v11, 6  ;;  %v960_v12 = vpop.f32.mrf.mxu1 }
 0xc08   :  { %v963_v1 = vadd.f32 %v960_v12, %v936_v35 }
 0xc09   :  { %v877_v13 = vadd.f32 %v875_v36, %v2261_v0 }
 0xc0a   :  { %1734 = vtanh.f32 %v963_v1  ;;  %v1626_v4 = vmul.f32 -1.442695, %v963_v1 }
 0xc0b   :  { %1736 = vtanh.f32 %v877_v13  ;;  %v1623_v37 = vmul.f32 -1.442695, %v877_v13 }
 0xc0d   :  { %1738 = vpow2.f32 %v1623_v37 }
 0xc10   :  { %v1735_v40 = vpop.eup %1734 }
 0xc11   :  { %v1737_v14 = vpop.eup %1736  ;;  %986 = vrot.lane.b32.xlu0 %v1735_v40, %s1929_s19 }
 0xc12   :  { %903 = vrot.lane.b32.xlu2 %v1737_v14, %s1929_s19 }
 0xc13   :  { %v1739_v41 = vpop.eup %1738 }
 0xc14   :  { %v881_v42 = vadd.f32 1.0, %v1739_v41 }
 0xc16   :  { %1740 = vrcp.f32 %v881_v42  ;;  %v893_v18 = vand.u32 2147483648, %v881_v42  ;;  %vm887_vm9 = vweird.f32 %v881_v42  ;;  %v891_v9 = vand.u32 2147483647, %v881_v42 }
 0xc17   :  { %1742 = vpow2.f32 %v1626_v4 }
 0xc18   :  { %v894_v20 = vor.u32 1.1754944e-38, %v893_v18  ;;  %vm892_vm11 = vcmp.eq.f32.partialorder %v891_v9, 8.507059e+37 }
 0xc1c   :  { %v1741_v43 = vpop.eup %1740 }
 0xc1d   :  { %v883_v15 = vmul.f32 %v1741_v43, %v881_v42  ;;  %v1743_v5 = vpop.eup %1742  ;;  %vm888_vm8 = vweird.f32 %v1741_v43 }
 0xc1e   :  { %v967_v7 = vadd.f32 1.0, %v1743_v5  ;;  %vm889_vm10 = vmor %vm887_vm9, %vm888_vm8 }
 0xc1f   :  { %v884_v16 = vsub.f32 1.0, %v883_v15 }
 0xc20   :  { %1744 = vrcp.f32 %v967_v7  ;;  %v979_v29 = vand.u32 2147483648, %v967_v7  ;;  %vm973_vm13 = vweird.f32 %v967_v7  ;;  %v977_v30 = vand.u32 2147483647, %v967_v7 }
 0xc21   :  { %v885_v17 = vmul.f32 %v1741_v43, %v884_v16 }
 0xc22   :  { %v980_v38 = vor.u32 1.1754944e-38, %v979_v29  ;;  %vm978_vm15 = vcmp.eq.f32.partialorder %v977_v30, 8.507059e+37 }
 0xc23   :  { %v886_v56 = vadd.f32 %v1741_v43, %v885_v17 }
 0xc25   :  { %v890_v19 = vsel %vm889_vm10, %v1741_v43, %v886_v56 }
 0xc26   :  { %v895_v22 = vsel %vm892_vm11, %v894_v20, %v890_v19  ;;  %v1745_v23 = vpop.eup %1744 }
 0xc27   :  { %v969_v25 = vmul.f32 %v1745_v23, %v967_v7  ;;  %vm974_vm12 = vweird.f32 %v1745_v23  ;;  %v901_v50 = vmul.f32 %v899_v48, %v895_v22 }
 0xc28   :  { %vm975_vm14 = vmor %vm973_vm13, %vm974_vm12 }
 0xc29   :  { %v970_v26 = vsub.f32 1.0, %v969_v25 }
 0xc2b   :  { %v971_v27 = vmul.f32 %v1745_v23, %v970_v26 }
 0xc2d   :  { %v972_v28 = vadd.f32 %v1745_v23, %v971_v27 }
 0xc2f   :  { %v976_v31 = vsel %vm975_vm14, %v1745_v23, %v972_v28 }
 0xc30   :  { %v981_v44 = vsel %vm978_vm15, %v980_v38, %v976_v31 }
 0xc31   :  { %v984_v32 = vmul.f32 %v981_v44, %v2275_v54 }
 0xc6c   :  { %v904_v21 = vpop.permute.xlu2 %903 }
 0xc6d   :  { %v906_v24 = vmul.f32 %v904_v21, %v895_v22 }
 0xc6f   :  { %908 = vrot.lane.b32.xlu1 %v906_v24, %s1929_s19 }
 0xc83   :  { %v987_v39 = vpop.permute.xlu0 %986 }
 0xc84   :  { %v989_v45 = vmul.f32 %v987_v39, %v981_v44 }
 0xc86   :  { %991 = vrot.lane.b32.xlu2 %v989_v45, %s1929_s19 }
 0xce0   :  { %v992_v49 = vpop.permute.xlu2 %991 }
 0xce1   :  { %v2304_v51 = vadd.f32 %v992_v49, %v984_v32  ;;  %v909_v52 = vpop.permute.xlu1 %908 }
 0xce2   :  { %v2306_v53 = vadd.f32 %v909_v52, %v901_v50 }
 0xce3   :  { %1746 = vtanh.f32 %v2304_v51 }
 0xce4   :  { %1748 = vtanh.f32 %v2306_v53  ;;  %v1052_v31 = vrot.slane %v2306_v53, 6 }
 0xce9   :  { %v1747_v57 = vpop.eup %1746 }
 0xcea   :  { %v1749_v58 = vpop.eup %1748  ;;  %997 = vrot.lane.b32.xlu1 %v1747_v57, %s1929_s19 }
 0xceb   :  { %914 = vrot.lane.b32.xlu0 %v1749_v58, %s1929_s19 }
 0xd5c   :  { %v998_v33 = vpop.permute.xlu1 %997 }
 0xd5d   :  { %v1000_v59 = vmul.f32 %v998_v33, %v981_v44  ;;  %v915_v47 = vpop.permute.xlu0 %914 }
 0xd5e   :  { %v917_v61 = vmul.f32 %v915_v47, %v895_v22 }
 0xd5f   :  { %1092 = vrot.lane.b32.xlu0 %v1000_v59, %s1930_s3 }
 0xd60   :  { %v1002_v63 = vrot.slane %v917_v61, 2  ;;  %v2342_v61 = vld [vmem:[%s2402_s6] ss:$0 sm:$0xff] }
 0xd62   :  { %1003 = vrot.lane.b32.xlu2 %v1002_v63, %s1930_s3 }
 0xdbc   :  { %v1004_v2 = vpop.permute.xlu2 %1003 }
 0xdbd   :  { %1627 = vmatmul.msk.f32.vlgmr.msra.gmra.mxu2 %vm161_vm1, %v1004_v2  ;;  %1629 = vmatmul.msk.f32.vlgmr.msra.gmra.mxu3 %vm161_vm1, %v1004_v2 }
 0xdd1   :  { %v1093_v54 = vpop.permute.xlu0 %1092 }
 0xdd2   :  { %1630 = vmatmul.msk.f32.vlgmr.msra.gmra.mxu0 %vm161_vm1, %v1093_v54 }
 0xe40   :  { %v1024_v3 = vpop.f32.mrf.mxu2  ;;  %v1088_v55 = vpop.f32.mrf.mxu3 }
 0xe41   :  { %v1028_v60 = vrot.slane %v1024_v3, 4  ;;  %v1089_v10 = vadd.f32 %v2149_v46, %v1088_v55 }
 0xe43   :  { %v1030_v6 = vadd.f32 %v1028_v60, %v2261_v0 }
 0xe45   :  { %1750 = vtanh.f32 %v1030_v6  ;;  %v1628_v12 = vmul.f32 -1.442695, %v1030_v6 }
 0xe4b   :  { %v1751_v8 = vpop.eup %1750 }
 0xe4c   :  { %1056 = vrot.lane.b32.xlu1 %v1751_v8, %s1929_s19 }
 0xe4f   :  { %v1113_v62 = vpop.f32.mrf.mxu0 }
 0xe50   :  { %v1116_v34 = vadd.f32 %v1113_v62, %v1089_v10 }
 0xe52   :  { %1752 = vtanh.f32 %v1116_v34  ;;  %v1631_v11 = vmul.f32 -1.442695, %v1116_v34 }
 0xe54   :  { %1754 = vpow2.f32 %v1631_v11 }
 0xe55   :  { %1756 = vpow2.f32 %v1628_v12 }
 0xe58   :  { %v1753_v35 = vpop.eup %1752 }
 0xe59   :  { %1139 = vrot.lane.b32.xlu2 %v1753_v35, %s1929_s19 }
 0xe5a   :  { %v1755_v36 = vpop.eup %1754 }
 0xe5b   :  { %v1120_v1 = vadd.f32 1.0, %v1755_v36  ;;  %v1757_v13 = vpop.eup %1756 }
 0xe5c   :  { %v1034_v14 = vadd.f32 1.0, %v1757_v13 }
 0xe5d   :  { %1758 = vrcp.f32 %v1120_v1  ;;  %v1132_v15 = vand.u32 2147483648, %v1120_v1  ;;  %vm1126_vm2 = vweird.f32 %v1120_v1  ;;  %v1130_v16 = vand.u32 2147483647, %v1120_v1 }
 0xe5e   :  { %1760 = vrcp.f32 %v1034_v14  ;;  %v1046_v21 = vand.u32 2147483648, %v1034_v14  ;;  %vm1040_vm6 = vweird.f32 %v1034_v14  ;;  %v1044_v22 = vand.u32 2147483647, %v1034_v14 }
 0xe5f   :  { %v1133_v7 = vor.u32 1.1754944e-38, %v1132_v15  ;;  %vm1131_vm4 = vcmp.eq.f32.partialorder %v1130_v16, 8.507059e+37 }
 0xe60   :  { %v1047_v24 = vor.u32 1.1754944e-38, %v1046_v21  ;;  %vm1045_vm8 = vcmp.eq.f32.partialorder %v1044_v22, 8.507059e+37 }
 0xe63   :  { %v1759_v40 = vpop.eup %1758 }
 0xe64   :  { %v1122_v37 = vmul.f32 %v1759_v40, %v1120_v1  ;;  %v1761_v46 = vpop.eup %1760  ;;  %vm1127_vm0 = vweird.f32 %v1759_v40 }
 0xe65   :  { %v1036_v43 = vmul.f32 %v1761_v46, %v1034_v14  ;;  %vm1128_vm3 = vmor %vm1126_vm2, %vm1127_vm0  ;;  %vm1041_vm5 = vweird.f32 %v1761_v46 }
 0xe66   :  { %v1123_v41 = vsub.f32 1.0, %v1122_v37  ;;  %vm1042_vm7 = vmor %vm1040_vm6, %vm1041_vm5  ;;  %vm1488_vm6 = vcmask 1041408  }
 0xe67   :  { %v1037_v5 = vsub.f32 1.0, %v1036_v43 }
 0xe68   :  { %v1124_v42 = vmul.f32 %v1759_v40, %v1123_v41 }
 0xe69   :  { %v1038_v9 = vmul.f32 %v1761_v46, %v1037_v5 }
 0xe6a   :  { %v1125_v4 = vadd.f32 %v1759_v40, %v1124_v42 }
 0xe6b   :  { %v1039_v20 = vadd.f32 %v1761_v46, %v1038_v9 }
 0xe6c   :  { %v1129_v17 = vsel %vm1128_vm3, %v1759_v40, %v1125_v4 }
 0xe6d   :  { %v1134_v18 = vsel %vm1131_vm4, %v1133_v7, %v1129_v17  ;;  %v1043_v23 = vsel %vm1042_vm7, %v1761_v46, %v1039_v20  ;;  %vm1457_vm7 = vcmask 9216  }
 0xe6e   :  { %v1048_v25 = vsel %vm1045_vm8, %v1047_v24, %v1043_v23  ;;  %v1137_v28 = vmul.f32 %v1134_v18, %v2304_v51 }
 0xe6f   :  { %v1054_v39 = vmul.f32 %v1052_v31, %v1048_v25 }
 0xeb3   :  { %v1140_v56 = vpop.permute.xlu2 %1139 }
 0xeb4   :  { %v1142_v19 = vmul.f32 %v1140_v56, %v1134_v18 }
 0xeb6   :  { %1144 = vrot.lane.b32.xlu1 %v1142_v19, %s1929_s19 }
 0xebe   :  { %v1057_v26 = vpop.permute.xlu1 %1056 }
 0xebf   :  { %v1059_v27 = vmul.f32 %v1057_v26, %v1048_v25 }
 0xec1   :  { %1061 = vrot.lane.b32.xlu0 %v1059_v27, %s1929_s19 }
 0xf28   :  { %v1145_v29 = vpop.permute.xlu1 %1144 }
 0xf29   :  { %v2324_v30 = vadd.f32 %v1145_v29, %v1137_v28 }
 0xf2b   :  { %1762 = vtanh.f32 %v2324_v30 }
 0xf31   :  { %v1763_v38 = vpop.eup %1762 }
 0xf32   :  { %1150 = vrot.lane.b32.xlu0 %v1763_v38, %s1929_s19 }
 0xf33   :  { %v1062_v44 = vpop.permute.xlu0 %1061 }
 0xf34   :  { %v2329_v45 = vadd.f32 %v1062_v44, %v1054_v39 }
 0xf36   :  { %1764 = vtanh.f32 %v2329_v45  ;;  %v1205_v20 = vrot.slane %v2329_v45, 6 }
 0xf3c   :  { %v1765_v48 = vpop.eup %1764 }
 0xf3d   :  { %1067 = vrot.lane.b32.xlu2 %v1765_v48, %s1929_s19 }
 0xf97   :  { %v1068_v32 = vpop.permute.xlu2 %1067 }
 0xf98   :  { %v1070_v49 = vmul.f32 %v1068_v32, %v1048_v25 }
 0xf9a   :  { %v1155_v50 = vrot.slane %v1070_v49, 4 }
 0xf9c   :  { %1156 = vrot.lane.b32.xlu1 %v1155_v50, %s1930_s3 }
 0xfa4   :  { %v1151_v51 = vpop.permute.xlu0 %1150 }
 0xfa5   :  { %v1153_v52 = vmul.f32 %v1151_v51, %v1134_v18 }
 0xfa7   :  { %1245 = vrot.lane.b32.xlu2 %v1153_v52, %s1930_s3 }
0x1001   :  { %v1246_v53 = vpop.permute.xlu2 %1245 }
0x1002   :  { %1635 = vmatmul.msk.f32.vlgmr.msrb.gmra.mxu3 %vm161_vm1, %v1246_v53 }
0x100e   :  { %v1157_v57 = vpop.permute.xlu1 %1156 }
0x100f   :  { %1632 = vmatmul.msk.f32.vlgmr.msrb.gmra.mxu1 %vm161_vm1, %v1157_v57  ;;  %1634 = vmatmul.msk.f32.vlgmr.msrb.gmra.mxu2 %vm161_vm1, %v1157_v57 }
0x1085   :  { %v1266_v2 = vpop.f32.mrf.mxu3 }
0x108c   :  { %v1177_v58 = vpop.f32.mrf.mxu1 }
0x108d   :  { %v1181_v33 = vrot.slane %v1177_v58, 2 }
0x108f   :  { %v1183_v59 = vadd.f32 %v1181_v33, %v2261_v0 }
0x1091   :  { %1766 = vtanh.f32 %v1183_v59  ;;  %v1633_v6 = vmul.f32 -1.442695, %v1183_v59 }
0x1092   :  { %v1241_v47 = vpop.f32.mrf.mxu2 }
0x1093   :  { %v1242_v63 = vadd.f32 %v2342_v61, %v1241_v47 }
0x1095   :  { %v1269_v54 = vadd.f32 %v1266_v2, %v1242_v63 }
0x1097   :  { %v1767_v3 = vpop.eup %1766  ;;  %1768 = vtanh.f32 %v1269_v54  ;;  %v1636_v0 = vmul.f32 -1.442695, %v1269_v54 }
0x1098   :  { %1209 = vrot.lane.b32.xlu0 %v1767_v3, %s1929_s19  ;;  %1770 = vpow2.f32 %v1633_v6 }
0x1099   :  { %1772 = vpow2.f32 %v1636_v0 }
0x109d   :  { %v1769_v60 = vpop.eup %1768 }
0x109e   :  { %1292 = vrot.lane.b32.xlu1 %v1769_v60, %s1929_s19  ;;  %v1771_v8 = vpop.eup %1770 }
0x109f   :  { %v1187_v55 = vadd.f32 1.0, %v1771_v8  ;;  %v1773_v10 = vpop.eup %1772 }
0x10a0   :  { %v1273_v62 = vadd.f32 1.0, %v1773_v10 }
0x10a1   :  { %1774 = vrcp.f32 %v1187_v55  ;;  %v1199_v14 = vand.u32 2147483648, %v1187_v55  ;;  %vm1193_vm10 = vweird.f32 %v1187_v55  ;;  %v1197_v37 = vand.u32 2147483647, %v1187_v55 }
0x10a2   :  { %1776 = vrcp.f32 %v1273_v62  ;;  %v1285_v16 = vand.u32 2147483648, %v1273_v62  ;;  %vm1279_vm14 = vweird.f32 %v1273_v62  ;;  %v1283_v17 = vand.u32 2147483647, %v1273_v62 }
0x10a3   :  { %v1200_v42 = vor.u32 1.1754944e-38, %v1199_v14  ;;  %vm1198_vm12 = vcmp.eq.f32.partialorder %v1197_v37, 8.507059e+37 }
0x10a4   :  { %v1286_v56 = vor.u32 1.1754944e-38, %v1285_v16  ;;  %vm1284_vm0 = vcmp.eq.f32.partialorder %v1283_v17, 8.507059e+37 }
0x10a7   :  { %v1775_v34 = vpop.eup %1774 }
0x10a8   :  { %v1189_v35 = vmul.f32 %v1775_v34, %v1187_v55  ;;  %v1777_v11 = vpop.eup %1776  ;;  %vm1194_vm9 = vweird.f32 %v1775_v34 }
0x10a9   :  { %v1275_v12 = vmul.f32 %v1777_v11, %v1273_v62  ;;  %vm1195_vm11 = vmor %vm1193_vm10, %vm1194_vm9  ;;  %vm1280_vm13 = vweird.f32 %v1777_v11 }
0x10aa   :  { %v1190_v36 = vsub.f32 1.0, %v1189_v35  ;;  %vm1281_vm15 = vmor %vm1279_vm14, %vm1280_vm13  ;;  %v1398_v35 = vld [vmem:[#allocation7 + $0x10] sm:$0xff]  ;;  %vm1575_vm13 = vcmask 25600  }
0x10ab   :  { %v1276_v13 = vsub.f32 1.0, %v1275_v12 }
0x10ac   :  { %v1191_v1 = vmul.f32 %v1775_v34, %v1190_v36  ;;  %v1396_v36 = vld [vmem:[#allocation7] sm:$0xff] }
0x10ad   :  { %v1277_v41 = vmul.f32 %v1777_v11, %v1276_v13 }
0x10ae   :  { %v1192_v40 = vadd.f32 %v1775_v34, %v1191_v1 }
0x10af   :  { %v1278_v43 = vadd.f32 %v1777_v11, %v1277_v41 }
0x10b0   :  { %v1196_v46 = vsel %vm1195_vm11, %v1775_v34, %v1192_v40  ;;  %v1399_v34 = vld [vmem:[#allocation7 + $0x18] sm:$0xff]  ;;  %v1659_v40 = vld [vmem:[%s2406_s10] ss:$0 sm:$0xff] }
0x10b1   :  { %v1201_v15 = vsel %vm1198_vm12, %v1200_v42, %v1196_v46  ;;  %v1282_v7 = vsel %vm1281_vm15, %v1777_v11, %v1278_v43  ;;  %1421 = vmatpush.msra.mxu2 %v1399_v34  ;;  %v1397_v11 = vld [vmem:[#allocation7 + $0x8] sm:$0xff]  ;;  %vm1484_vm12 = vcmask 15360  }
0x10b2   :  { %v1287_v9 = vsel %vm1284_vm0, %v1286_v56, %v1282_v7  ;;  %v1207_v21 = vmul.f32 %v1205_v20, %v1201_v15  ;;  %v1514_v56 = vld [vmem:[#allocation8 + $0x18] sm:$0xff] }
0x10b3   :  { %v1290_v25 = vmul.f32 %v1287_v9, %v2324_v30  ;;  %1422 = vmatpush.msra.mxu2 %v1398_v35  ;;  %1534 = vmatpush.msrb.mxu1 %v1514_v56 }
0x10b5   :  { %1423 = vmatpush.msra.mxu2 %v1397_v11 }
0x10b7   :  { %1424 = vmatpush.msra.mxu2 %v1396_v36 }
0x110a   :  { %v1210_v4 = vpop.permute.xlu0 %1209 }
0x110b   :  { %v1212_v5 = vmul.f32 %v1210_v4, %v1201_v15 }
0x110d   :  { %1214 = vrot.lane.b32.xlu2 %v1212_v5, %s1929_s19 }
0x1110   :  { %v1293_v18 = vpop.permute.xlu1 %1292 }
0x1111   :  { %v1295_v19 = vmul.f32 %v1293_v18, %v1287_v9  ;;  %v1513_v18 = vld [vmem:[#allocation8 + $0x10] sm:$0xff] }
0x1112   :  { %1535 = vmatpush.msrb.mxu1 %v1513_v18 }
0x1113   :  { %1297 = vrot.lane.b32.xlu0 %v1295_v19, %s1929_s19 }
0x1167   :  { %v1215_v22 = vpop.permute.xlu2 %1214 }
0x1168   :  { %v1217_v23 = vadd.f32 %v1215_v22, %v1207_v21 }
0x116a   :  { %1778 = vtanh.f32 %v1217_v23 }
0x1170   :  { %v1779_v24 = vpop.eup %1778 }
0x1171   :  { %1220 = vrot.lane.b32.xlu1 %v1779_v24, %s1929_s19 }
0x1185   :  { %v1298_v26 = vpop.permute.xlu0 %1297 }
0x1186   :  { %v1300_v27 = vadd.f32 %v1298_v26, %v1290_v25 }
0x1188   :  { %1780 = vtanh.f32 %v1300_v27 }
0x118e   :  { %v1781_v28 = vpop.eup %1780 }
0x118f   :  { %1303 = vrot.lane.b32.xlu2 %v1781_v28, %s1929_s19 }
0x11e3   :  { %v1221_v29 = vpop.permute.xlu1 %1220 }
0x11e4   :  { %v1223_v31 = vmul.f32 %v1221_v29, %v1201_v15 }
0x11e6   :  { %v1308_v38 = vrot.slane %v1223_v31, 6 }
0x11e8   :  { %1309 = vrot.lane.b32.xlu0 %v1308_v38, %s1930_s3  ;;  %v1511_v38 = vld [vmem:[#allocation8] sm:$0xff] }
0x11e9   :  { %v1304_v39 = vpop.permute.xlu2 %1303 }
0x11ea   :  { %v1306_v44 = vmul.f32 %v1304_v39, %v1287_v9  ;;  %v1512_v9 = vld [vmem:[#allocation8 + $0x8] sm:$0xff]  ;;  %v1547_v39 = vld [vmem:[%s2409_s13 + $0x18] sm:$0xff] }
0x11eb   :  { %1536 = vmatpush.msrb.mxu1 %v1512_v9  ;;  %1567 = vmatpush.msrb.mxu2 %v1547_v39 }
0x11ec   :  { %1334 = vrot.lane.b32.xlu1 %v1306_v44, %s1930_s3 }
0x11ed   :  { %1537 = vmatpush.msrb.mxu1 %v1511_v38 }
0x125a   :  { %v1310_v45 = vpop.permute.xlu0 %1309 }
0x125b   :  { %1637 = vmatmul.msk.f32.vlgmr.msrb.gmra.mxu0 %vm161_vm1, %v1310_v45  ;;  %v1546_v45 = vld [vmem:[%s2409_s13 + $0x10] sm:$0xff] }
0x125c   :  { %1568 = vmatpush.msrb.mxu2 %v1546_v45 }
0x125e   :  { %v1335_v48 = vpop.permute.xlu1 %1334 }
0x125f   :  { %1638 = vmatmul.msk.f32.vlgmr.msra.gmra.mxu1 %vm161_vm1, %v1335_v48  ;;  %v1545_v48 = vld [vmem:[%s2409_s13 + $0x8] sm:$0xff] }
0x1260   :  { %1569 = vmatpush.msrb.mxu2 %v1545_v48 }
0x12d8   :  { %v1330_v30 = vpop.f32.mrf.mxu0 }
0x12d9   :  { %v1331_v32 = vadd.f32 %v2342_v61, %v1330_v30  ;;  %v1544_v30 = vld [vmem:[%s2409_s13] sm:$0xff] }
0x12da   :  { %1570 = vmatpush.msrb.mxu2 %v1544_v30 }
0x12dc   :  { %v1355_v49 = vpop.f32.mrf.mxu1 }
0x12dd   :  { %v1358_v50 = vadd.f32 %v1355_v49, %v1331_v32  ;;  %v1660_v32 = vld [vmem:[%s2408_s12] ss:$0 sm:$0xff] }
0x12df   :  { %1782 = vtanh.f32 %v1358_v50  ;;  %v1639_v52 = vmul.f32 -1.442695, %v1358_v50 }
0x12e1   :  { %1784 = vpow2.f32 %v1639_v52  ;;  %v1661_v52 = vld [vmem:[%s2410_s14] ss:$0 sm:$0xff] }
0x12e5   :  { %v1783_v51 = vpop.eup %1782 }
0x12e6   :  { %1381 = vrot.lane.b32.xlu2 %v1783_v51, %s1929_s19 }
0x12e7   :  { %v1785_v53 = vpop.eup %1784 }
0x12e8   :  { %v1362_v57 = vadd.f32 1.0, %v1785_v53 }
0x12ea   :  { %1786 = vrcp.f32 %v1362_v57  ;;  %v1374_v2 = vand.u32 2147483648, %v1362_v57  ;;  %vm1368_vm3 = vweird.f32 %v1362_v57  ;;  %v1372_v61 = vand.u32 2147483647, %v1362_v57 }
0x12ec   :  { %v1375_v3 = vor.u32 1.1754944e-38, %v1374_v2  ;;  %vm1373_vm5 = vcmp.eq.f32.partialorder %v1372_v61, 8.507059e+37 }
0x12f0   :  { %v1787_v58 = vpop.eup %1786 }
0x12f1   :  { %v1364_v33 = vmul.f32 %v1787_v58, %v1362_v57  ;;  %vm1369_vm2 = vweird.f32 %v1787_v58 }
0x12f2   :  { %vm1370_vm4 = vmor %vm1368_vm3, %vm1369_vm2 }
0x12f3   :  { %v1365_v59 = vsub.f32 1.0, %v1364_v33 }
0x12f5   :  { %v1366_v47 = vmul.f32 %v1787_v58, %v1365_v59 }
0x12f7   :  { %v1367_v63 = vadd.f32 %v1787_v58, %v1366_v47 }
0x12f9   :  { %v1371_v54 = vsel %vm1370_vm4, %v1787_v58, %v1367_v63 }
0x12fa   :  { %v1376_v6 = vsel %vm1373_vm5, %v1375_v3, %v1371_v54 }
0x12fb   :  { %v1379_v8 = vmul.f32 %v1376_v6, %v1300_v27 }
0x1340   :  { %v1382_v60 = vpop.permute.xlu2 %1381 }
0x1341   :  { %v1384_v0 = vmul.f32 %v1382_v60, %v1376_v6 }
0x1343   :  { %1386 = vrot.lane.b32.xlu0 %v1384_v0, %s1929_s19 }
0x13b5   :  { %v1387_v55 = vpop.permute.xlu0 %1386 }
0x13b6   :  { %v1389_v10 = vadd.f32 %v1387_v55, %v1379_v8 }
0x13b8   :  { %1788 = vtanh.f32 %v1389_v10 }
0x13be   :  { %v1789_v62 = vpop.eup %1788 }
0x13bf   :  { %1392 = vrot.lane.b32.xlu1 %v1789_v62, %s1929_s19 }
0x1431   :  { %v1393_v12 = vpop.permute.xlu1 %1392 }
0x1432   :  { %v1395_v1 = vmul.f32 %v1393_v12, %v1376_v6 }
0x1434   :  { %1405 = vrot.lane.b32.xlu2 %v1395_v1, %s1930_s3 }
0x148e   :  { %v2362_v13 = vpop.permute.xlu2 %1405 }
0x148f   :  { %1640 = vmatmul.msk.f32.vlgmr.msra.gmra.mxu2 %vm161_vm1, %v2362_v13 }
0x1512   :  { %v1426_v14 = vpop.f32.mrf.mxu2 }
0x1513   :  { %v1427_v37 = vadd.f32 %v1659_v40, %v1426_v14 }
0x1515   :  { %1430 = vrot.lane.b32.xlu0 %v1427_v37, %s1931_s26 }
0x151d   :  { %1482 = vrot.lane.b32.xlu0 %v1427_v37, %s1930_s3  ;;  %s1582_s3 = sshll.u32 %s1932_s23, 4  ;;  %s1583_s3 = int_to_ptr.vmem [resolvable:$true] %s1582_s3 }
0x1587   :  { %v1431_v41 = vpop.permute.xlu0 %1430 }
0x1588   :  { %1641 = vmatpush.xpose.msk.msra.mxu3 %vm161_vm1, %v1431_v41 }
0x158b   :  { %1642 = vmatmul.msk.f32.vlgmr.msra.gmra.mxu3 %vm161_vm1, %v1427_v37 }
0x158f   :  { %v1483_v46 = vpop.permute.xlu0 %1482 }
0x1590   :  { %1643 = vmatpush.msk.msra.mxu0 %vm1488_vm6, %v1483_v46 }
0x160e   :  { %v1453_v42 = vpop.f32.mrf.mxu3 }
0x160f   :  { %v1456_v43 = vmul.f32 0.17677669, %v1453_v42 }
0x1611   :  { %v1458_v4 = vsel %vm1457_vm7, %v1456_v43, -inf }
0x1612   :  { %1459 = vmax.xlane.f32.xlu1 %v1458_v4 }
0x1685   :  { %v1460_v15 = vpop.xlane.xlu1 %1459 }
0x1686   :  { %v1461_v16 = vsub.f32 %v1456_v43, %v1460_v15 }
0x1688   :  { %v1462_v5 = vmul.f32 1.442695, %v1461_v16 }
0x168a   :  { %1790 = vpow2.f32 %v1462_v5 }
0x1690   :  { %v1791_v17 = vpop.eup %1790 }
0x1691   :  { %v1464_v7 = vsel %vm1457_vm7, %v1791_v17, 0.0 }
0x1692   :  { %1465 = vadd.xlane.f32.xlu2 %v1464_v7 }
0x1705   :  { %v1466_v19 = vpop.xlane.xlu2 %1465 }
0x1706   :  { %1792 = vrcp.f32 %v1466_v19  ;;  %v1478_v23 = vand.u32 2147483648, %v1466_v19  ;;  %v1476_v25 = vand.u32 2147483647, %v1466_v19  ;;  %vm1472_vm9 = vweird.f32 %v1466_v19 }
0x1708   :  { %v1479_v27 = vor.u32 1.1754944e-38, %v1478_v23  ;;  %vm1477_vm11 = vcmp.eq.f32.partialorder %v1476_v25, 8.507059e+37 }
0x170c   :  { %v1793_v20 = vpop.eup %1792 }
0x170d   :  { %v1468_v21 = vmul.f32 %v1793_v20, %v1466_v19  ;;  %vm1473_vm8 = vweird.f32 %v1793_v20 }
0x170e   :  { %vm1474_vm10 = vmor %vm1472_vm9, %vm1473_vm8 }
0x170f   :  { %v1469_v22 = vsub.f32 1.0, %v1468_v21 }
0x1711   :  { %v1470_v24 = vmul.f32 %v1793_v20, %v1469_v22 }
0x1713   :  { %v1471_v26 = vadd.f32 %v1793_v20, %v1470_v24 }
0x1715   :  { %v1475_v28 = vsel %vm1474_vm10, %v1793_v20, %v1471_v26 }
0x1716   :  { %v1480_v29 = vsel %vm1477_vm11, %v1479_v27, %v1475_v28 }
0x1717   :  { %v1481_v31 = vmul.f32 %v1791_v17, %v1480_v29 }
0x1719   :  { %1644 = vmatmul.msk.f32.vlgmr.msra.gmra.mxu0 %vm1484_vm12, %v1481_v31 }
0x1796   :  { %v1508_v44 = vpop.f32.mrf.mxu0 }
0x1797   :  { %1645 = vmatmul.msk.f32.vlgmr.msrb.gmra.mxu1 %vm161_vm1, %v1508_v44 }
0x1814   :  { %v1539_v49 = vpop.f32.mrf.mxu1 }
0x1815   :  { %v1540_v50 = vadd.f32 %v1660_v32, %v1539_v49 }
0x1817   :  { %v1543_v51 = vadd.f32 %v1540_v50, %v2362_v13 }
0x1819   :  { %1646 = vmatmul.msk.f32.vlgmr.msrb.gmra.mxu2 %vm161_vm1, %v1543_v51 }
0x189c   :  { %v1572_v53 = vpop.f32.mrf.mxu2 }
0x189d   :  { %v1573_v57 = vadd.f32 %v1661_v52, %v1572_v53 }
0x189f   :  { %1576 = vst.msk [vmem:[#allocation10] sm:$0x3] %vm1575_vm13, %v1573_v57 }
0x18a0   :  { %1587 = dma.vmem_to_hbm [thread:$0]  %s1583_s3, 32, %s1585_s20, [#allocation4]  }
0x18a1   :  { %1921 = dma.done.wait [#allocation4], 32  }
0x18a2   :  { %1922 = vsyncadd [#allocation4], 4294967264 }
0x18a3   :  { %1592 = vsyncpa [#allocation3], 1 }
0x18a4   :  { %1593 = vsyncpa [#allocation6], 1 }
0x18a5   :  { %1594 = vsyncpa [#allocation9], 1 }
0x18a6   :  { %1595 = vsyncpa [#allocation4], 1 }

</bundles_post_ra>
